<compile_context>
chip_gen: v6e
topology: v6e:2x2x1
jax: 0.10.0
libtpu: 0.0.40
codegen_flags: <defaults>
</compile_context>

<pallas_src>
import jax
import jax.numpy as jnp
from jax.experimental import pallas as pl
from jax.experimental.pallas import tpu as pltpu


def _value_net_kernel(xT_ref, w1_ref, b1_ref, w2_ref, b2_ref, w3_ref, b3_ref,
                      o_ref):
    xT = xT_ref[...]                       # [4, TB]   (batch on lanes)
    w1 = w1_ref[...]                       # [256, 4]  (PyTorch [out, in])

    # --- fc1 + ReLU on the VPU: K=4 -> 4 outer-product multiply-adds --------
    h1 = b1_ref[...] + w1[:, 0:1] * xT[0:1, :]       # [256,1] + [256,1]*[1,TB]
    for k in range(1, w1.shape[1]):                  # static unroll (K=4)
        h1 = h1 + w1[:, k:k + 1] * xT[k:k + 1, :]
    h1 = jnp.maximum(h1, 0.0)                        # [256, TB]

    # --- fc2 + ReLU on the MXU (the only matmul worth an MXU pass) ----------
    h2 = jnp.dot(w2_ref[...], h1,
                 preferred_element_type=jnp.float32) + b2_ref[...]
    h2 = jnp.maximum(h2, 0.0)                        # [32, TB]

    # --- fc3 (N=1): VPU multiply + XLU sublane reduce, scalar bias in SMEM --
    val = jnp.sum(h2 * w3_ref[...], axis=0, keepdims=True) + b3_ref[0]
    o_ref[...] = val.astype(o_ref.dtype)             # [1, TB] lane-dense store


def value_network_forward(x, params, *, tb=128):
    """x: [B, 4] float32 -> value: [B, 1] float32."""
    w1, b1, w2, b2, w3, b3 = params
    B, F = x.shape
    n_tiles = pl.cdiv(B, tb)
    b_pad = n_tiles * tb

    # Batch-on-lanes layout; pad ragged batch up to whole 128-lane tiles.
    xT = jnp.zeros((F, b_pad), x.dtype).at[:, :B].set(x.T)

    out_t = pl.pallas_call(
        _value_net_kernel,
        out_shape=jax.ShapeDtypeStruct((1, b_pad), jnp.float32),
        grid_spec=pltpu.PrefetchScalarGridSpec(
            num_scalar_prefetch=0,
            grid=(n_tiles,),
            in_specs=[
                # streamed per batch tile
                pl.BlockSpec((F, tb), lambda i: (0, i)),
                # weights / biases: constant index_map -> VMEM-resident
                pl.BlockSpec(w1.shape, lambda i: (0, 0)),
                pl.BlockSpec(b1.shape, lambda i: (0, 0)),
                pl.BlockSpec(w2.shape, lambda i: (0, 0)),
                pl.BlockSpec(b2.shape, lambda i: (0, 0)),
                pl.BlockSpec(w3.shape, lambda i: (0, 0)),
                # scalar fc3 bias lives in SMEM (no padded VMEM tile)
                pl.BlockSpec(memory_space=pltpu.MemorySpace.SMEM),
            ],
            out_specs=pl.BlockSpec((1, tb), lambda i: (0, i)),
        ),
        compiler_params=pltpu.CompilerParams(
            dimension_semantics=("parallel",),   # split batch across v7x TCs
        ),
    )(xT, w1, b1, w2, b2, w3, b3)

    return out_t[:, :B].T                                # [B, 1]


def init_params(key):
    """nn.Linear-style U(-1/sqrt(fan_in), 1/sqrt(fan_in)) init.

    Layout: w1 [256,4], b1 [256,1], w2 [32,256], b2 [32,1] (PyTorch [out,in]);
            w3 stored as a [32,1] column; b3 as a (1,) scalar.
    """
    def linear(k, fan_in, fan_out):
        kw, kb = jax.random.split(k)
        bound = 1.0 / (fan_in ** 0.5)
        w = jax.random.uniform(kw, (fan_out, fan_in), jnp.float32,
                               minval=-bound, maxval=bound)
        b = jax.random.uniform(kb, (fan_out, 1), jnp.float32,
                               minval=-bound, maxval=bound)
        return w, b

    k1, k2, k3 = jax.random.split(key, 3)
    w1, b1 = linear(k1, 4, 256)
    w2, b2 = linear(k2, 256, 32)
    w3_oi, b3_col = linear(k3, 32, 1)
    return w1, b1, w2, b2, w3_oi.T, b3_col[:, 0]


def reference_forward(x, params):
    w1, b1, w2, b2, w3, b3 = params
    h1 = jnp.maximum(x @ w1.T + b1[:, 0], 0.0)
    h2 = jnp.maximum(h1 @ w2.T + b2[:, 0], 0.0)
    return h2 @ w3 + b3


if __name__ == "__main__":
    key = jax.random.PRNGKey(0)
    kx, kp = jax.random.split(key)

    B = 200  # not a multiple of 128 -> exercises the multi-tile grid + padding
    x = jax.random.normal(kx, (B, 4), jnp.float32)
    params = init_params(kp)

    out = jax.block_until_ready(value_network_forward(x, params))
    ref = jax.block_until_ready(reference_forward(x, params))

    assert out.shape == (B, 1), out.shape
    assert jnp.allclose(out, ref, atol=1e-4, rtol=1e-4), (out, ref)
    print("KERNEL_OK")
</pallas_src>

<mosaic_0001>
module attributes {stable_mosaic.version = 11 : i64} {
  func.func @_value_net_kernel(%arg0: i32, %arg1: memref<4x128xf32, #tpu.memory_space<vmem>>, %arg2: memref<256x4xf32, #tpu.memory_space<vmem>>, %arg3: memref<256x1xf32, #tpu.memory_space<vmem>>, %arg4: memref<32x256xf32, #tpu.memory_space<vmem>>, %arg5: memref<32x1xf32, #tpu.memory_space<vmem>>, %arg6: memref<32x1xf32, #tpu.memory_space<vmem>>, %arg7: memref<1xf32, #tpu.memory_space<smem>>, %arg8: memref<1x128xf32, #tpu.memory_space<vmem>>) attributes {dimension_semantics = [#tpu.dimension_semantics<parallel>], iteration_bounds = array<i64: 2>, scalar_prefetch = 0 : i64, scratch_operands = 0 : i64, tpu.core_type = #tpu.core_type<tc>, window_params = [{transform_indices = @transform_0, window_bounds = array<i64: 4, 128>}, {pipeline_mode = #tpu.pipeline_mode<synchronous>, transform_indices = @transform_1, window_bounds = array<i64: 256, 4>}, {pipeline_mode = #tpu.pipeline_mode<synchronous>, transform_indices = @transform_2, window_bounds = array<i64: 256, 1>}, {pipeline_mode = #tpu.pipeline_mode<synchronous>, transform_indices = @transform_3, window_bounds = array<i64: 32, 256>}, {pipeline_mode = #tpu.pipeline_mode<synchronous>, transform_indices = @transform_4, window_bounds = array<i64: 32, 1>}, {pipeline_mode = #tpu.pipeline_mode<synchronous>, transform_indices = @transform_5, window_bounds = array<i64: 32, 1>}, {transform_indices = @transform_6, window_bounds = array<i64: 1>}, {transform_indices = @transform_7, window_bounds = array<i64: 1, 128>}]} {
    %c0 = arith.constant 0 : index
    %c0_0 = arith.constant 0 : index
    %0 = vector.load %arg1[%c0, %c0_0] : memref<4x128xf32, #tpu.memory_space<vmem>>, vector<4x128xf32>
    %c0_1 = arith.constant 0 : index
    %c0_2 = arith.constant 0 : index
    %1 = vector.load %arg2[%c0_1, %c0_2] : memref<256x4xf32, #tpu.memory_space<vmem>>, vector<256x4xf32>
    %c0_3 = arith.constant 0 : index
    %c0_4 = arith.constant 0 : index
    %2 = vector.load %arg3[%c0_3, %c0_4] : memref<256x1xf32, #tpu.memory_space<vmem>>, vector<256x1xf32>
    %3 = vector.extract_strided_slice %1 {offsets = [0, 0], sizes = [256, 1], strides = [1, 1]} : vector<256x4xf32> to vector<256x1xf32>
    %4 = vector.extract_strided_slice %0 {offsets = [0, 0], sizes = [1, 128], strides = [1, 1]} : vector<4x128xf32> to vector<1x128xf32>
    %5 = vector.broadcast %3 : vector<256x1xf32> to vector<256x128xf32>
    %6 = vector.broadcast %4 : vector<1x128xf32> to vector<256x128xf32>
    %7 = arith.mulf %5, %6 : vector<256x128xf32>
    %8 = vector.broadcast %2 : vector<256x1xf32> to vector<256x128xf32>
    %9 = arith.addf %8, %7 : vector<256x128xf32>
    %10 = vector.extract_strided_slice %1 {offsets = [0, 1], sizes = [256, 1], strides = [1, 1]} : vector<256x4xf32> to vector<256x1xf32>
    %11 = vector.extract_strided_slice %0 {offsets = [1, 0], sizes = [1, 128], strides = [1, 1]} : vector<4x128xf32> to vector<1x128xf32>
    %12 = vector.broadcast %10 : vector<256x1xf32> to vector<256x128xf32>
    %13 = vector.broadcast %11 : vector<1x128xf32> to vector<256x128xf32>
    %14 = arith.mulf %12, %13 : vector<256x128xf32>
    %15 = arith.addf %9, %14 : vector<256x128xf32>
    %16 = vector.extract_strided_slice %1 {offsets = [0, 2], sizes = [256, 1], strides = [1, 1]} : vector<256x4xf32> to vector<256x1xf32>
    %17 = vector.extract_strided_slice %0 {offsets = [2, 0], sizes = [1, 128], strides = [1, 1]} : vector<4x128xf32> to vector<1x128xf32>
    %18 = vector.broadcast %16 : vector<256x1xf32> to vector<256x128xf32>
    %19 = vector.broadcast %17 : vector<1x128xf32> to vector<256x128xf32>
    %20 = arith.mulf %18, %19 : vector<256x128xf32>
    %21 = arith.addf %15, %20 : vector<256x128xf32>
    %22 = vector.extract_strided_slice %1 {offsets = [0, 3], sizes = [256, 1], strides = [1, 1]} : vector<256x4xf32> to vector<256x1xf32>
    %23 = vector.extract_strided_slice %0 {offsets = [3, 0], sizes = [1, 128], strides = [1, 1]} : vector<4x128xf32> to vector<1x128xf32>
    %24 = vector.broadcast %22 : vector<256x1xf32> to vector<256x128xf32>
    %25 = vector.broadcast %23 : vector<1x128xf32> to vector<256x128xf32>
    %26 = arith.mulf %24, %25 : vector<256x128xf32>
    %27 = arith.addf %21, %26 : vector<256x128xf32>
    %cst = arith.constant 0.000000e+00 : f32
    %28 = vector.broadcast %cst : f32 to vector<256x128xf32>
    %29 = arith.maximumf %27, %28 : vector<256x128xf32>
    %c0_5 = arith.constant 0 : index
    %c0_6 = arith.constant 0 : index
    %30 = vector.load %arg4[%c0_5, %c0_6] : memref<32x256xf32, #tpu.memory_space<vmem>>, vector<32x256xf32>
    %cst_7 = arith.constant dense<0.000000e+00> : vector<32x128xf32>
    %31 = tpu.matmul %30, %29, %cst_7 {dimension_numbers = #tpu.dot_dimension_numbers<[1], [0], [0], [1], [0, 0, 1, 1], [], []>} : vector<32x256xf32>, vector<256x128xf32>, vector<32x128xf32> -> vector<32x128xf32>
    %c0_8 = arith.constant 0 : index
    %c0_9 = arith.constant 0 : index
    %32 = vector.load %arg5[%c0_8, %c0_9] : memref<32x1xf32, #tpu.memory_space<vmem>>, vector<32x1xf32>
    %33 = vector.broadcast %32 : vector<32x1xf32> to vector<32x128xf32>
    %34 = arith.addf %31, %33 : vector<32x128xf32>
    %cst_10 = arith.constant 0.000000e+00 : f32
    %35 = vector.broadcast %cst_10 : f32 to vector<32x128xf32>
    %36 = arith.maximumf %34, %35 : vector<32x128xf32>
    %c0_11 = arith.constant 0 : index
    %c0_12 = arith.constant 0 : index
    %37 = vector.load %arg6[%c0_11, %c0_12] : memref<32x1xf32, #tpu.memory_space<vmem>>, vector<32x1xf32>
    %38 = vector.broadcast %37 : vector<32x1xf32> to vector<32x128xf32>
    %39 = arith.mulf %36, %38 : vector<32x128xf32>
    %cst_13 = arith.constant dense<0.000000e+00> : vector<128xf32>
    %40 = vector.multi_reduction <add>, %39, %cst_13 [0] : vector<32x128xf32> to vector<128xf32>
    %41 = vector.shape_cast %40 : vector<128xf32> to vector<1x128xf32>
    %c0_14 = arith.constant 0 : index
    %42 = memref.load %arg7[%c0_14] : memref<1xf32, #tpu.memory_space<smem>>
    %43 = vector.broadcast %42 : f32 to vector<1x128xf32>
    %44 = arith.addf %41, %43 : vector<1x128xf32>
    %c0_15 = arith.constant 0 : index
    %c0_16 = arith.constant 0 : index
    %45 = vector.load %arg8[%c0_15, %c0_16] : memref<1x128xf32, #tpu.memory_space<vmem>>, vector<1x128xf32>
    tpu.vector_store %arg8[%c0_15, %c0_16], %44 {strides = array<i32>} : memref<1x128xf32, #tpu.memory_space<vmem>>, vector<1x128xf32>,
    return
  }
  func.func @transform_0(%arg0: i32) -> (i32, i32) {
    %c0_i32 = arith.constant 0 : i32
    %c0_i32_0 = arith.constant 0 : i32
    return %c0_i32, %arg0 : i32, i32
  }
  func.func @transform_1(%arg0: i32) -> (i32, i32) {
    %c0_i32 = arith.constant 0 : i32
    %c0_i32_0 = arith.constant 0 : i32
    %c0_i32_1 = arith.constant 0 : i32
    return %c0_i32, %c0_i32_0 : i32, i32
  }
  func.func @transform_2(%arg0: i32) -> (i32, i32) {
    %c0_i32 = arith.constant 0 : i32
    %c0_i32_0 = arith.constant 0 : i32
    %c0_i32_1 = arith.constant 0 : i32
    return %c0_i32, %c0_i32_0 : i32, i32
  }
  func.func @transform_3(%arg0: i32) -> (i32, i32) {
    %c0_i32 = arith.constant 0 : i32
    %c0_i32_0 = arith.constant 0 : i32
    %c0_i32_1 = arith.constant 0 : i32
    return %c0_i32, %c0_i32_0 : i32, i32
  }
  func.func @transform_4(%arg0: i32) -> (i32, i32) {
    %c0_i32 = arith.constant 0 : i32
    %c0_i32_0 = arith.constant 0 : i32
    %c0_i32_1 = arith.constant 0 : i32
    return %c0_i32, %c0_i32_0 : i32, i32
  }
  func.func @transform_5(%arg0: i32) -> (i32, i32) {
    %c0_i32 = arith.constant 0 : i32
    %c0_i32_0 = arith.constant 0 : i32
    %c0_i32_1 = arith.constant 0 : i32
    return %c0_i32, %c0_i32_0 : i32, i32
  }
  func.func @transform_6(%arg0: i32) -> i32 {
    %c0_i32 = arith.constant 0 : i32
    %c0_i32_0 = arith.constant 0 : i32
    return %c0_i32 : i32
  }
  func.func @transform_7(%arg0: i32) -> (i32, i32) {
    %c0_i32 = arith.constant 0 : i32
    %c0_i32_0 = arith.constant 0 : i32
    return %c0_i32, %arg0 : i32, i32
  }
}

</mosaic_0001>

<bundles_post_ra>
// kernel: tpu_custom_call.1
= control target key start
LH: loop header
LB: loop body
LE: loop exit
PB: predicated region body
PF: predicated region fallthrough
CT: control target
= control target key end

     0   :  { %s2853_s0 = inlined_call_operand.vmem [shape: f32[4,256], index: 0, kind: input, shape index: {}]   ;;  %s2854_s1 = inlined_call_operand.vmem [shape: f32[256,4], index: 1, kind: input, shape index: {}]   ;;  %s2855_s2 = inlined_call_operand.vmem [shape: f32[256,1], index: 2, kind: input, shape index: {}]   ;;  %s2856_s3 = inlined_call_operand.vmem [shape: f32[32,256], index: 3, kind: input, shape index: {}]   ;;  %s2857_s4 = inlined_call_operand.vmem [shape: f32[32,1], index: 4, kind: input, shape index: {}]   ;;  %s2858_s5 = inlined_call_operand.vmem [shape: f32[32,1], index: 5, kind: input, shape index: {}]   ;;  %s2859_s6 = inlined_call_operand.<no memory space> [shape: f32[1], index: 6, kind: input, shape index: {}]   ;;  %s2860_s7 = inlined_call_operand.hbm [shape: f32[1,256], index: 7, kind: output, shape index: {}]  }
   0x1   :  { %12 = sst [smem:[#allocation2]] %s2859_s6 }
   0x2   :  { %13 = vsyncpa [#allocation4], 0 }
   0x3   :  { %15 = vsyncpa [#allocation4 + $0x1], 0  ;;  %s1841_s26 = smov 0   ;;  %s1843_s27 = smov 0  }
   0x4   :  { %s1845_s28 = smov 0   ;;  %s1847_s29 = smov 0  }
   0x5 LB: > { %s1862_s6 = sadd.s32 4294967295, %s1791_s29   ;;  %s1577_s30 = sadd.s32 4294967294, %s1791_s29   ;;  %s1791_s29 = sphi %s1847_s29, %s2957_s29   ;;  %s1787_s28 = sphi %s1845_s28, %s2956_s28   ;;  %s1783_s27 = sphi %s1843_s27, %s2955_s27   ;;  %s1779_s26 = sphi %s1841_s26, %s2954_s26  }
   0x6   : > { %s1866_s8 = sadd.s32 1, %s1791_s29   ;;  %s180_s9 = sadd.s32 1, %s1787_s28 }
   0x7   : > { %s177_s10 = ssub.s32 %s1791_s29, %s1866_s8  ;;  %p190_p0 = scmp.ne.s32.totalorder %s1787_s28, %s1783_s27 }
   0x8   : > { %p178_p1 = scmp.eq.s32.totalorder %s177_s10, 0  ;;  %p191_p2 = scmp.eq.s32.totalorder %s1862_s6, 1 }
   0x9   : > { %p196_p3 = scmp.ne.s32.totalorder %s1783_s27, %s1779_s26  ;;  %p197_p4 = scmp.eq.s32.totalorder %s1577_s30, 1 }
   0xa   : > { %s1877_s11 = scalar_select %p178_p1, %s1787_s28, %s180_s9  }
   0xb   : > { %p1879_p5 = por %p191_p2, %p190_p0  ;;  %p1883_p6 = por %p197_p4, %p196_p3 }
   0xc   : > { %p1580_p7 = scmp.ge.s32.totalorder %s1791_s29, 1  ;;  %p240_p8 = scmp.lt.s32.totalorder %s1791_s29, 3 }
   0xe   : > { %p241_p9 = pnand %p1580_p7, %p240_p8 }
  0x10   : > { %244 = sbr.rel (%p241_p9) target bundleno = 750 (0x2ee), region = 48 }
  0x15   : > { %v1892_v0 = vld [vmem:[%s2854_s1 + $0x10] sm:$0xff]  ;;  %v1897_v1 = vld [vmem:[%s2854_s1] sm:$0xff]  ;;  %v2861_v2 = vmov 0   ;;  %v1906_v3 = vld [vmem:[%s2854_s1 + $0x18] sm:$0xff]  ;;  %p270_p10 = scmp.lt.s32.totalorder %s1862_s6, 1  ;;  %s1505_s14 = sld [smem:[#allocation2]] }
  0x16   : > { %1705 = vset.pattern.permute.xlu1 %v2861_v2  ;;  %1704 = vset.pattern.permute.xlu0 %v2861_v2  ;;  %v1911_v4 = vld [vmem:[%s2854_s1 + $0x8] sm:$0xff]  ;;  %v1923_v6 = vld [vmem:[%s2854_s1 + $0x20] sm:$0xff]  ;;  %v1930_v7 = vld [vmem:[%s2854_s1 + $0x38] sm:$0xff]  ;;  %s268_s15 = sand.u32 1, %s1783_s27   ;;  %s1582_s16 = sshll.u32 %s1862_s6, 4 }
  0x17   : > { %351 = vperm.xlu1 %1705, %v1892_v0   ;;  %341 = vperm.xlu0 %1704, %v1897_v1   ;;  %v1918_v5 = vld [vmem:[%s2854_s1 + $0x28] sm:$0xff]  ;;  %v1935_v8 = vld [vmem:[%s2854_s1 + $0x30] sm:$0xff]  ;;  %v1947_v10 = vld [vmem:[%s2854_s1 + $0x40] sm:$0xff]  ;;  %s271_s22 = scalar_select %p270_p10, %s1862_s6, 1 }
  0x18   : > { %2872 = vst [vmem:[#allocation6_spill] sm:$0xff] %v1935_v8  ;;  %v1942_v9 = vld [vmem:[%s2854_s1 + $0x48] sm:$0xff]  ;;  %v1954_v11 = vld [vmem:[%s2854_s1 + $0x58] sm:$0xff]  ;;  %v1959_v12 = vld [vmem:[%s2854_s1 + $0x50] sm:$0xff]  ;;  %s269_s17 = scalar_lea.vmem [#allocation3], %s268_s15  ;;  %s1520_s21 = scalar_lea.hbm %s2860_s7, %s1582_s16 }
  0x19   : > { %v1966_v13 = vld [vmem:[%s2854_s1 + $0x68] sm:$0xff]  ;;  %v1971_v14 = vld [vmem:[%s2854_s1 + $0x60] sm:$0xff]  ;;  %v1978_v15 = vld [vmem:[%s2854_s1 + $0x78] sm:$0xff]  ;;  %s1581_s23 = sshll.u32 %s271_s22, 2  ;;  %s1522_s18 = sshll.u32 %s269_s17, 4  ;;  %s1523_s18 = int_to_ptr.vmem [resolvable:$true] %s1522_s18 }
  0x1a   : > { %v1983_v16 = vld [vmem:[%s2854_s1 + $0x70] sm:$0xff]  ;;  %v1990_v17 = vld [vmem:[%s2854_s1 + $0x88] sm:$0xff]  ;;  %v1995_v18 = vld [vmem:[%s2854_s1 + $0x80] sm:$0xff]  ;;  %s273_s30 = scalar_lea.vmem %s2853_s0, %s1581_s23  ;;  %s1510_s22 = scalar_lea.sflag [#allocation4], %s268_s15 }
  0x1b   : > { %356 = vperm.xlu1 %1705, %v1906_v3   ;;  %346 = vperm.xlu0 %1704, %v1911_v4   ;;  %v2002_v19 = vld [vmem:[%s2854_s1 + $0x98] sm:$0xff]  ;;  %v2007_v20 = vld [vmem:[%s2854_s1 + $0x90] sm:$0xff]  ;;  %v2014_v21 = vld [vmem:[%s2854_s1 + $0xa8] sm:$0xff]  ;;  %s1731_s23 = scalar_lea.vmem %s1523_s18, 16  ;;  %s1797_s24 = smov [#allocation3]  }
  0x1c   : > { %v2019_v22 = vld [vmem:[%s2854_s1 + $0xa0] sm:$0xff]  ;;  %v2026_v23 = vld [vmem:[%s2854_s1 + $0xb8] sm:$0xff]  ;;  %v2031_v24 = vld [vmem:[%s2854_s1 + $0xb0] sm:$0xff]  ;;  %p1732_p11 = scmp.ne.s32.totalorder %s1523_s18, %s1731_s23  ;;  %s1735_s25 = sshll.u32 %s1797_s24, 4  ;;  %s1736_s25 = int_to_ptr.vmem [resolvable:$false] %s1735_s25 }
  0x1d   : > { %v2038_v25 = vld [vmem:[%s2854_s1 + $0xc8] sm:$0xff]  ;;  %v2043_v26 = vld [vmem:[%s2854_s1 + $0xc0] sm:$0xff]  ;;  %v2050_v27 = vld [vmem:[%s2854_s1 + $0xd8] sm:$0xff]  ;;  %s1737_s6 = scalar_lea.vmem %s1736_s25, 32  ;;  %p1738_p0 = scmp.lt.s32.totalorder %s1523_s18, %s1736_s25 }
  0x1e   : > { %v2055_v28 = vld [vmem:[%s2854_s1 + $0xd0] sm:$0xff]  ;;  %v2062_v29 = vld [vmem:[%s2854_s1 + $0xe8] sm:$0xff]  ;;  %v2067_v30 = vld [vmem:[%s2854_s1 + $0xe0] sm:$0xff]  ;;  %p1733_p12 = pnand %p1732_p11, %p1879_p5  ;;  %p1739_p1 = scmp.lt.s32.totalorder %s1737_s6, %s1731_s23 }
  0x1f   : > { %366 = vperm.xlu1 %1705, %v1918_v5   ;;  %361 = vperm.xlu0 %1704, %v1923_v6   ;;  %v2074_v31 = vld [vmem:[%s2854_s1 + $0xf8] sm:$0xff]  ;;  %v2079_v32 = vld [vmem:[%s2854_s1 + $0xf0] sm:$0xff]  ;;  %v308_v33 = vld [vmem:[%s2855_s2 + $0x8] sm:$0xff] }
  0x20   : > { %v307_v34 = vld [vmem:[%s2855_s2] sm:$0xff]  ;;  %v310_v35 = vld [vmem:[%s2855_s2 + $0x18] sm:$0xff]  ;;  %v309_v36 = vld [vmem:[%s2855_s2 + $0x10] sm:$0xff]  ;;  %p1734_p13 = pneg %p1733_p12  ;;  %p1740_p2 = por %p1739_p1, %p1738_p0 }
  0x21   : > { %v312_v37 = vld [vmem:[%s2855_s2 + $0x28] sm:$0xff]  ;;  %v311_v38 = vld [vmem:[%s2855_s2 + $0x20] sm:$0xff]  ;;  %v314_v39 = vld [vmem:[%s2855_s2 + $0x38] sm:$0xff] }
  0x22   : > { %v313_v40 = vld [vmem:[%s2855_s2 + $0x30] sm:$0xff]  ;;  %v316_v41 = vld [vmem:[%s2855_s2 + $0x48] sm:$0xff]  ;;  %v315_v42 = vld [vmem:[%s2855_s2 + $0x40] sm:$0xff]  ;;  %p1741_p3 = pnand %p1740_p2, %p1734_p13 }
  0x23   : > { %376 = vperm.xlu1 %1705, %v1930_v7   ;;  %371 = vperm.xlu0 %1704, %v1935_v8   ;;  %v318_v43 = vld [vmem:[%s2855_s2 + $0x58] sm:$0xff]  ;;  %v317_v44 = vld [vmem:[%s2855_s2 + $0x50] sm:$0xff]  ;;  %v320_v45 = vld [vmem:[%s2855_s2 + $0x68] sm:$0xff] }
  0x24   : > { %v319_v46 = vld [vmem:[%s2855_s2 + $0x60] sm:$0xff]  ;;  %v322_v47 = vld [vmem:[%s2855_s2 + $0x78] sm:$0xff]  ;;  %v321_v48 = vld [vmem:[%s2855_s2 + $0x70] sm:$0xff] }
  0x25   : > { %v324_v49 = vld [vmem:[%s2855_s2 + $0x88] sm:$0xff]  ;;  %v323_v50 = vld [vmem:[%s2855_s2 + $0x80] sm:$0xff]  ;;  %v326_v51 = vld [vmem:[%s2855_s2 + $0x98] sm:$0xff] }
  0x26   : > { %v325_v52 = vld [vmem:[%s2855_s2 + $0x90] sm:$0xff]  ;;  %v328_v53 = vld [vmem:[%s2855_s2 + $0xa8] sm:$0xff]  ;;  %v327_v54 = vld [vmem:[%s2855_s2 + $0xa0] sm:$0xff] }
  0x27   : > { %386 = vperm.xlu1 %1705, %v1942_v9   ;;  %381 = vperm.xlu0 %1704, %v1947_v10   ;;  %v330_v55 = vld [vmem:[%s2855_s2 + $0xb8] sm:$0xff]  ;;  %v329_v56 = vld [vmem:[%s2855_s2 + $0xb0] sm:$0xff]  ;;  %v332_v57 = vld [vmem:[%s2855_s2 + $0xc8] sm:$0xff] }
  0x28   : > { %v331_v58 = vld [vmem:[%s2855_s2 + $0xc0] sm:$0xff]  ;;  %v334_v59 = vld [vmem:[%s2855_s2 + $0xd8] sm:$0xff]  ;;  %v333_v60 = vld [vmem:[%s2855_s2 + $0xd0] sm:$0xff] }
  0x29   : > { %v336_v61 = vld [vmem:[%s2855_s2 + $0xe8] sm:$0xff]  ;;  %v335_v62 = vld [vmem:[%s2855_s2 + $0xe0] sm:$0xff]  ;;  %v338_v63 = vld [vmem:[%s2855_s2 + $0xf8] sm:$0xff] }
  0x2b   : > { %396 = vperm.xlu1 %1705, %v1954_v11   ;;  %391 = vperm.xlu0 %1704, %v1959_v12  }
  0x2f   : > { %406 = vperm.xlu1 %1705, %v1966_v13   ;;  %401 = vperm.xlu0 %1704, %v1971_v14  }
  0x33   : > { %416 = vperm.xlu1 %1705, %v1978_v15   ;;  %411 = vperm.xlu0 %1704, %v1983_v16  }
  0x37   : > { %426 = vperm.xlu1 %1705, %v1990_v17   ;;  %421 = vperm.xlu0 %1704, %v1995_v18  }
  0x3b   : > { %436 = vperm.xlu1 %1705, %v2002_v19   ;;  %431 = vperm.xlu0 %1704, %v2007_v20  }
  0x3f   : > { %446 = vperm.xlu1 %1705, %v2014_v21   ;;  %441 = vperm.xlu0 %1704, %v2019_v22  }
  0x43   : > { %456 = vperm.xlu1 %1705, %v2026_v23   ;;  %451 = vperm.xlu0 %1704, %v2031_v24  }
  0x47   : > { %466 = vperm.xlu1 %1705, %v2038_v25   ;;  %461 = vperm.xlu0 %1704, %v2043_v26  }
  0x4b   : > { %476 = vperm.xlu1 %1705, %v2050_v27   ;;  %471 = vperm.xlu0 %1704, %v2055_v28  }
  0x4f   : > { %486 = vperm.xlu1 %1705, %v2062_v29   ;;  %481 = vperm.xlu0 %1704, %v2067_v30  }
  0x53   : > { %496 = vperm.xlu1 %1705, %v2074_v31   ;;  %491 = vperm.xlu0 %1704, %v2079_v32  }
  0x57   : > { %542 = vperm.xlu1 %1705, %v308_v33   ;;  %537 = vperm.xlu0 %1704, %v307_v34   ;;  %v337_v33 = vld [vmem:[%s2855_s2 + $0xf0] sm:$0xff] }
  0x5b   : > { %552 = vperm.xlu1 %1705, %v310_v35   ;;  %547 = vperm.xlu0 %1704, %v309_v36  }
  0x5f   : > { %562 = vperm.xlu1 %1705, %v312_v37   ;;  %557 = vperm.xlu0 %1704, %v311_v38   ;;  %v2865_v38 = vmov 1  }
  0x63   : > { %572 = vperm.xlu1 %1705, %v314_v39   ;;  %567 = vperm.xlu0 %1704, %v313_v40  }
  0x67   : > { %582 = vperm.xlu1 %1705, %v316_v41   ;;  %577 = vperm.xlu0 %1704, %v315_v42  }
  0x6b   : > { %592 = vperm.xlu1 %1705, %v318_v43   ;;  %587 = vperm.xlu0 %1704, %v317_v44  }
  0x6f   : > { %602 = vperm.xlu1 %1705, %v320_v45   ;;  %597 = vperm.xlu0 %1704, %v319_v46  }
  0x73   : > { %612 = vperm.xlu1 %1705, %v322_v47   ;;  %607 = vperm.xlu0 %1704, %v321_v48  }
  0x77   : > { %622 = vperm.xlu1 %1705, %v324_v49   ;;  %617 = vperm.xlu0 %1704, %v323_v50  }
  0x7b   : > { %632 = vperm.xlu1 %1705, %v326_v51   ;;  %627 = vperm.xlu0 %1704, %v325_v52  }
  0x7f   : > { %642 = vperm.xlu1 %1705, %v328_v53   ;;  %637 = vperm.xlu0 %1704, %v327_v54  }
  0x83   : > { %652 = vperm.xlu1 %1705, %v330_v55   ;;  %647 = vperm.xlu0 %1704, %v329_v56  }
  0x87   : > { %662 = vperm.xlu1 %1705, %v332_v57   ;;  %657 = vperm.xlu0 %1704, %v331_v58  }
  0x8b   : > { %672 = vperm.xlu1 %1705, %v334_v59   ;;  %667 = vperm.xlu0 %1704, %v333_v60  }
  0x8f   : > { %682 = vperm.xlu1 %1705, %v336_v61   ;;  %677 = vperm.xlu0 %1704, %v335_v62  }
  0x92   : > { %v2179_v34 = vpop.permute.xlu1 %351  ;;  %v2181_v35 = vpop.permute.xlu0 %341 }
  0x93   : > { %2873 = vst [vmem:[#allocation7_spill] sm:$0xff] %v2179_v34  ;;  %692 = vperm.xlu1 %1705, %v338_v63   ;;  %687 = vperm.xlu0 %1704, %v337_v33   ;;  %v2863_v63 = vmov 2   ;;  %v2867_v34 = vmov 3  }
  0x96   : > { %v2183_v36 = vpop.permute.xlu1 %356  ;;  %v2185_v37 = vpop.permute.xlu0 %346 }
  0x97   : > { %2874 = vst [vmem:[#allocation8_spill] sm:$0xff] %v2185_v37  ;;  %1707 = vset.pattern.permute.xlu1 %v2865_v38  ;;  %1706 = vset.pattern.permute.xlu0 %v2865_v38 }
  0x98   : > { %732 = vperm.xlu1 %1707, %v1911_v4   ;;  %728 = vperm.xlu0 %1706, %v1897_v1  }
  0x9a   : > { %v2191_v39 = vpop.permute.xlu1 %366  ;;  %v2193_v40 = vpop.permute.xlu0 %361 }
  0x9b   : > { %2875 = vst [vmem:[#allocation9_spill] sm:$0xff] %v2193_v40 }
  0x9c   : > { %736 = vperm.xlu1 %1707, %v1892_v0   ;;  %740 = vperm.xlu0 %1706, %v1906_v3  }
  0x9e   : > { %v2197_v41 = vpop.permute.xlu1 %376  ;;  %v2199_v42 = vpop.permute.xlu0 %371 }
  0x9f   : > { %2876 = vst [vmem:[#allocation10_spill] sm:$0xff] %v2199_v42 }
  0xa0   : > { %744 = vperm.xlu1 %1707, %v1923_v6   ;;  %748 = vperm.xlu0 %1706, %v1918_v5  }
  0xa2   : > { %v2203_v43 = vpop.permute.xlu1 %386  ;;  %v2205_v44 = vpop.permute.xlu0 %381 }
  0xa3   : > { %2877 = vst [vmem:[#allocation11_spill] sm:$0xff] %v2205_v44  ;;  %v2896_v44 = vmov 3  }
  0xa4   : > { %752 = vperm.xlu1 %1707, %v1935_v8   ;;  %756 = vperm.xlu0 %1706, %v1930_v7  }
  0xa6   : > { %v2209_v45 = vpop.permute.xlu1 %396  ;;  %v2211_v46 = vpop.permute.xlu0 %391 }
  0xa7   : > { %2878 = vst [vmem:[#allocation12_spill] sm:$0xff] %v2209_v45  ;;  %2879 = vst [vmem:[#allocation13_spill] sm:$0xff] %v2211_v46 }
  0xa8   : > { %760 = vperm.xlu1 %1707, %v1947_v10   ;;  %764 = vperm.xlu0 %1706, %v1942_v9  }
  0xaa   : > { %v2215_v47 = vpop.permute.xlu1 %406  ;;  %v2217_v48 = vpop.permute.xlu0 %401 }
  0xab   : > { %2880 = vst [vmem:[#allocation14_spill] sm:$0xff] %v2215_v47  ;;  %2881 = vst [vmem:[#allocation15_spill] sm:$0xff] %v2217_v48 }
  0xac   : > { %768 = vperm.xlu1 %1707, %v1959_v12   ;;  %772 = vperm.xlu0 %1706, %v1954_v11  }
  0xae   : > { %v2221_v49 = vpop.permute.xlu1 %416  ;;  %v2223_v50 = vpop.permute.xlu0 %411 }
  0xaf   : > { %2882 = vst [vmem:[#allocation16_spill] sm:$0xff] %v2223_v50 }
  0xb0   : > { %776 = vperm.xlu1 %1707, %v1971_v14   ;;  %780 = vperm.xlu0 %1706, %v1966_v13  }
  0xb2   : > { %v2227_v51 = vpop.permute.xlu1 %426  ;;  %v2229_v52 = vpop.permute.xlu0 %421 }
  0xb3   : > { %2883 = vst [vmem:[#allocation17_spill] sm:$0xff] %v2229_v52 }
  0xb4   : > { %784 = vperm.xlu1 %1707, %v1983_v16   ;;  %788 = vperm.xlu0 %1706, %v1978_v15  }
  0xb6   : > { %v2233_v53 = vpop.permute.xlu1 %436  ;;  %v2235_v54 = vpop.permute.xlu0 %431 }
  0xb8   : > { %792 = vperm.xlu1 %1707, %v1995_v18   ;;  %796 = vperm.xlu0 %1706, %v1990_v17  }
  0xba   : > { %v2239_v55 = vpop.permute.xlu1 %446  ;;  %v2241_v56 = vpop.permute.xlu0 %441 }
  0xbb   : > { %2884 = vst [vmem:[#allocation18_spill] sm:$0xff] %v2239_v55  ;;  %v2892_v55 = vmov 2  }
  0xbc   : > { %800 = vperm.xlu1 %1707, %v2007_v20   ;;  %804 = vperm.xlu0 %1706, %v2002_v19  }
  0xbe   : > { %v2245_v57 = vpop.permute.xlu1 %456  ;;  %v2247_v58 = vpop.permute.xlu0 %451 }
  0xbf   : > { %2885 = vst [vmem:[#allocation19_spill] sm:$0xff] %v2245_v57 }
  0xc0   : > { %808 = vperm.xlu1 %1707, %v2019_v22   ;;  %852 = vperm.xlu0 %1706, %v2074_v31  }
  0xc2   : > { %v2251_v59 = vpop.permute.xlu1 %466  ;;  %v2253_v60 = vpop.permute.xlu0 %461 }
  0xc3   : > { %2886 = vst [vmem:[#allocation20_spill] sm:$0xff] %v2251_v59 }
  0xc4   : > { %848 = vperm.xlu1 %1707, %v2079_v32   ;;  %840 = vperm.xlu0 %1706, %v2067_v30  }
  0xc6   : > { %v2257_v61 = vpop.permute.xlu1 %476  ;;  %v2259_v62 = vpop.permute.xlu0 %471 }
  0xc7   : > { %2887 = vst [vmem:[#allocation21_spill] sm:$0xff] %v2257_v61 }
  0xc8   : > { %1708 = vset.pattern.permute.xlu1 %v2863_v63  ;;  %832 = vperm.xlu0 %1706, %v2055_v28  }
  0xc9   : > { %984 = vperm.xlu1 %1708, %v1978_v15  }
  0xca   : > { %v2264_v33 = vpop.permute.xlu1 %486  ;;  %v2266_v2 = vpop.permute.xlu0 %481 }
  0xcb   : > { %2888 = vst [vmem:[#allocation22_spill] sm:$0xff] %v2264_v33  ;;  %2889 = vst [vmem:[#allocation23_spill] sm:$0xff] %v2266_v2 }
  0xcc   : > { %824 = vperm.xlu0 %1706, %v2043_v26  }
  0xcd   : > { %1709 = vset.pattern.permute.xlu1 %v2865_v38 }
  0xce   : > { %v2270_v52 = vpop.permute.xlu1 %496  ;;  %844 = vperm.xlu1 %1709, %v2062_v29   ;;  %v2273_v37 = vpop.permute.xlu0 %491 }
  0xcf   : > { %2890 = vst [vmem:[#allocation24_spill] sm:$0xff] %v2273_v37 }
  0xd0   : > { %816 = vperm.xlu0 %1706, %v2031_v24  }
  0xd2   : > { %v2276_v63 = vpop.permute.xlu1 %542  ;;  %1710 = vset.pattern.permute.xlu1 %v2867_v34  ;;  %v2279_v40 = vpop.permute.xlu0 %537 }
  0xd3   : > { %2891 = vst [vmem:[#allocation25_spill] sm:$0xff] %v2276_v63  ;;  %1244 = vperm.xlu1 %1710, %v2074_v31  }
  0xd4   : > { %1723 = vset.pattern.permute.xlu0 %v2892_v55 }
  0xd5   : > { %1048 = vperm.xlu0 %1723, %v2074_v31  }
  0xd6   : > { %v2284_v38 = vpop.permute.xlu1 %552  ;;  %v2286_v42 = vpop.permute.xlu0 %547 }
  0xd7   : > { %2893 = vst [vmem:[#allocation26_spill] sm:$0xff] %v2286_v42  ;;  %1180 = vperm.xlu1 %1710, %v1978_v15  }
  0xd9   : > { %1044 = vperm.xlu0 %1723, %v2079_v32  }
  0xda   : > { %v2290_v63 = vpop.permute.xlu1 %562  ;;  %v2292_v57 = vpop.permute.xlu0 %557 }
  0xdb   : > { %2894 = vst [vmem:[#allocation27_spill] sm:$0xff] %v2292_v57  ;;  %1711 = vset.pattern.permute.xlu1 %v2892_v55 }
  0xdc   : > { %1040 = vperm.xlu1 %1711, %v2062_v29  }
  0xdd   : > { %980 = vperm.xlu0 %1723, %v1983_v16  }
  0xde   : > { %v2297_v34 = vpop.permute.xlu1 %572  ;;  %v2299_v31 = vpop.permute.xlu0 %567 }
  0xdf   : > { %2895 = vst [vmem:[#allocation28_spill] sm:$0xff] %v2299_v31  ;;  %v2900_v31 = vmov 1  }
  0xe0   : > { %1712 = vset.pattern.permute.xlu1 %v2896_v44 }
  0xe1   : > { %1240 = vperm.xlu1 %1712, %v2079_v32   ;;  %976 = vperm.xlu0 %1723, %v1966_v13  }
  0xe2   : > { %v2304_v15 = vpop.permute.xlu1 %582  ;;  %v2306_v42 = vpop.permute.xlu0 %577 }
  0xe3   : > { %2897 = vst [vmem:[#allocation29_spill] sm:$0xff] %v2306_v42 }
  0xe5   : > { %1176 = vperm.xlu1 %1712, %v1983_v16   ;;  %1036 = vperm.xlu0 %1723, %v2067_v30  }
  0xe6   : > { %v2310_v57 = vpop.permute.xlu1 %592  ;;  %v2312_v59 = vpop.permute.xlu0 %587 }
  0xe7   : > { %2898 = vst [vmem:[#allocation30_spill] sm:$0xff] %v2310_v57  ;;  %2899 = vst [vmem:[#allocation31_spill] sm:$0xff] %v2312_v59 }
  0xe9   : > { %1713 = vset.pattern.permute.xlu1 %v2900_v31  ;;  %972 = vperm.xlu0 %1723, %v1971_v14  }
  0xea   : > { %v2316_v32 = vpop.permute.xlu1 %602  ;;  %836 = vperm.xlu1 %1713, %v2050_v27   ;;  %v2319_v46 = vpop.permute.xlu0 %597 }
  0xeb   : > { %2901 = vst [vmem:[#allocation32_spill] sm:$0xff] %v2316_v32  ;;  %2902 = vst [vmem:[#allocation33_spill] sm:$0xff] %v2319_v46  ;;  %v499_v46 = vlaneseq  ;;  %v2361_v32 = vld [vmem:[%s273_s30] sm:$0xf] }
  0xed   : > { %968 = vperm.xlu0 %1723, %v1954_v11  }
  0xee   : > { %v2322_v16 = vpop.permute.xlu1 %612  ;;  %1714 = vset.pattern.permute.xlu1 %v2896_v44  ;;  %v2325_v42 = vpop.permute.xlu0 %607 }
  0xef   : > { %2903 = vst [vmem:[#allocation34_spill] sm:$0xff] %v2325_v42  ;;  %1236 = vperm.xlu1 %1714, %v2062_v29  }
  0xf1   : > { %1028 = vperm.xlu0 %1723, %v2055_v28  }
  0xf2   : > { %v2330_v59 = vpop.permute.xlu1 %622  ;;  %v2332_v57 = vpop.permute.xlu0 %617 }
  0xf3   : > { %2904 = vst [vmem:[#allocation35_spill] sm:$0xff] %v2332_v57  ;;  %1172 = vperm.xlu1 %1714, %v1966_v13   ;;  %v2348_v13 = vshrl.u32 %v499_v46, 7 }
  0xf5   : > { %964 = vperm.xlu0 %1723, %v1959_v12  }
  0xf6   : > { %v2337_v45 = vpop.permute.xlu1 %632  ;;  %v2339_v61 = vpop.permute.xlu0 %627 }
  0xf7   : > { %1715 = vset.pattern.permute.xlu1 %v2892_v55 }
  0xf8   : > { %1032 = vperm.xlu1 %1715, %v2050_v27  }
  0xf9   : > { %960 = vperm.xlu0 %1723, %v1942_v9  }
  0xfa   : > { %v2344_v29 = vpop.permute.xlu1 %642  ;;  %v2346_v57 = vpop.permute.xlu0 %637 }
  0xfb   : > { %2905 = vst [vmem:[#allocation36_spill] sm:$0xff] %v2344_v29  ;;  %v501_v29 = vsub.s32 0, %v2348_v13 }
  0xfc   : > { %1716 = vset.pattern.permute.xlu1 %v2896_v44 }
  0xfd   : > { %1232 = vperm.xlu1 %1716, %v2067_v30   ;;  %1020 = vperm.xlu0 %1723, %v2043_v26   ;;  %v2370_v30 = vrot.slane %v2361_v32, %v501_v29 }
  0xfe   : > { %v2356_v48 = vpop.permute.xlu1 %652  ;;  %v2358_v2 = vpop.permute.xlu0 %647 }
  0xff   : > { %2906 = vst [vmem:[#allocation37_spill] sm:$0xff] %v2356_v48  ;;  %v529_v48 = vmul.f32 %v2370_v30, %v2259_v62  ;;  %v857_v62 = vsub.s32 1, %v2348_v13 }
 0x101   : > { %1168 = vperm.xlu1 %1716, %v1971_v14   ;;  %956 = vperm.xlu0 %1723, %v1947_v10  }
 0x102   : > { %v2365_v46 = vpop.permute.xlu1 %662  ;;  %v2367_v47 = vpop.permute.xlu0 %657 }
 0x103   : > { %2907 = vst [vmem:[#allocation38_spill] sm:$0xff] %v2365_v46 }
 0x105   : > { %1717 = vset.pattern.permute.xlu1 %v2900_v31  ;;  %952 = vperm.xlu0 %1723, %v1930_v7  }
 0x106   : > { %v2376_v33 = vpop.permute.xlu1 %672  ;;  %828 = vperm.xlu1 %1717, %v2038_v25   ;;  %v668_v14 = vpop.permute.xlu0 %667 }
 0x107   : > { %2908 = vst [vmem:[#allocation39_spill] sm:$0xff] %v2376_v33  ;;  %v2379_v42 = vadd.f32 %v668_v14, %v529_v48  ;;  %v2396_v48 = vrot.slane %v2361_v32, %v857_v62  ;;  %v503_v14 = vmul.f32 %v2370_v30, %v2181_v35 }
 0x109   : > { %1012 = vperm.xlu0 %1723, %v2031_v24  }
 0x10a   : > { %v2382_v46 = vpop.permute.xlu1 %682  ;;  %1718 = vset.pattern.permute.xlu1 %v2896_v44  ;;  %v2385_v29 = vpop.permute.xlu0 %677 }
 0x10b   : > { %2909 = vst [vmem:[#allocation40_spill] sm:$0xff] %v2382_v46  ;;  %2910 = vst [vmem:[#allocation41_spill] sm:$0xff] %v2385_v29  ;;  %1228 = vperm.xlu1 %1718, %v2050_v27   ;;  %v695_v46 = vadd.f32 %v2279_v40, %v503_v14  ;;  %v508_v40 = vmul.f32 %v2370_v30, %v2191_v39 }
 0x10d   : > { %948 = vperm.xlu0 %1723, %v1935_v8  }
 0x10e   : > { %v2390_v33 = vpop.permute.xlu1 %692  ;;  %v2392_v50 = vpop.permute.xlu0 %687 }
 0x10f   : > { %2911 = vst [vmem:[#allocation42_spill] sm:$0xff] %v2392_v50  ;;  %1164 = vperm.xlu1 %1718, %v1954_v11   ;;  %v506_v11 = vmul.f32 %v2370_v30, %v2183_v36 }
 0x111   : > { %1008 = vperm.xlu0 %1723, %v2014_v21   ;;  %v698_v8 = vadd.f32 %v2284_v38, %v506_v11 }
 0x113   : > { %1719 = vset.pattern.permute.xlu1 %v2892_v55  ;;  %v2402_v27 = vpop.permute.xlu1 %732  ;;  %v729_v29 = vpop.permute.xlu0 %728 }
 0x114   : > { %2912 = vst [vmem:[#allocation43_spill] sm:$0xff] %v2402_v27  ;;  %v859_v37 = vmul.f32 %v2396_v48, %v729_v29  ;;  %1024 = vperm.xlu1 %1719, %v2038_v25  }
 0x115   : > { %944 = vperm.xlu0 %1723, %v1918_v5  }
 0x116   : > { %v2410_v62 = vadd.f32 %v859_v37, %v695_v46  ;;  %v700_v46 = vadd.f32 %v2290_v63, %v508_v40 }
 0x117   : > { %v2412_v50 = vpop.permute.xlu1 %736  ;;  %v741_v35 = vpop.permute.xlu0 %740 }
 0x118   : > { %2913 = vst [vmem:[#allocation44_spill] sm:$0xff] %v2410_v62  ;;  %v862_v27 = vmul.f32 %v2396_v48, %v741_v35  ;;  %1720 = vset.pattern.permute.xlu1 %v2896_v44 }
 0x119   : > { %1224 = vperm.xlu1 %1720, %v2055_v28   ;;  %1004 = vperm.xlu0 %1723, %v2019_v22   ;;  %v510_v28 = vmul.f32 %v2370_v30, %v2197_v41 }
 0x11a   : > { %v2421_v29 = vadd.f32 %v862_v27, %v698_v8 }
 0x11b   : > { %v2423_v36 = vpop.permute.xlu1 %744  ;;  %v749_v37 = vpop.permute.xlu0 %748  ;;  %v702_v39 = vadd.f32 %v2297_v34, %v510_v28 }
 0x11c   : > { %v864_v38 = vmul.f32 %v2396_v48, %v749_v37 }
 0x11d   : > { %1160 = vperm.xlu1 %1720, %v1959_v12   ;;  %940 = vperm.xlu0 %1723, %v1923_v6   ;;  %v512_v12 = vmul.f32 %v2370_v30, %v2203_v43 }
 0x11e   : > { %v2431_v14 = vadd.f32 %v864_v38, %v700_v46 }
 0x11f   : > { %v2433_v11 = vpop.permute.xlu1 %752  ;;  %v757_v8 = vpop.permute.xlu0 %756  ;;  %v704_v40 = vadd.f32 %v2304_v15, %v512_v12 }
 0x120   : > { %v866_v27 = vmul.f32 %v2396_v48, %v757_v8 }
 0x121   : > { %1721 = vset.pattern.permute.xlu1 %v2900_v31  ;;  %1000 = vperm.xlu0 %1723, %v2002_v19  }
 0x122   : > { %v2441_v63 = vadd.f32 %v866_v27, %v702_v39  ;;  %820 = vperm.xlu1 %1721, %v2026_v23  }
 0x123   : > { %v2444_v41 = vpop.permute.xlu1 %760  ;;  %v765_v35 = vpop.permute.xlu0 %764 }
 0x124   : > { %v868_v34 = vmul.f32 %v2396_v48, %v765_v35  ;;  %v521_v35 = vmul.f32 %v2370_v30, %v2235_v54 }
 0x125   : > { %936 = vperm.xlu0 %1723, %v1906_v3  }
 0x126   : > { %v2449_v37 = vadd.f32 %v868_v34, %v704_v40  ;;  %1722 = vset.pattern.permute.xlu1 %v2896_v44 }
 0x127   : > { %1220 = vperm.xlu1 %1722, %v2038_v25   ;;  %v2453_v43 = vpop.permute.xlu1 %768  ;;  %v2455_v46 = vpop.permute.xlu0 %772  ;;  %v520_v25 = vmul.f32 %v2370_v30, %v2227_v51 }
 0x129   : > { %996 = vperm.xlu0 %1723, %v2007_v20   ;;  %v712_v27 = vadd.f32 %v2330_v59, %v520_v25  ;;  %v713_v25 = vadd.f32 %v2339_v61, %v521_v35 }
 0x12b   : > { %1156 = vperm.xlu1 %1722, %v1942_v9   ;;  %v2459_v38 = vpop.permute.xlu1 %776  ;;  %v2461_v15 = vpop.permute.xlu0 %780 }
 0x12d   : > { %932 = vperm.xlu0 %1723, %v1892_v0  }
 0x12f   : > { %1724 = vset.pattern.permute.xlu1 %v2892_v55  ;;  %v2465_v28 = vpop.permute.xlu1 %784  ;;  %v789_v8 = vpop.permute.xlu0 %788  ;;  %v522_v55 = vmul.f32 %v2370_v30, %v2233_v53  ;;  %v523_v53 = vmul.f32 %v2370_v30, %v2241_v56 }
 0x130   : > { %1016 = vperm.xlu1 %1724, %v2026_v23  }
 0x131   : > { %992 = vperm.xlu0 %1723, %v1990_v17   ;;  %v714_v59 = vadd.f32 %v2337_v45, %v522_v55  ;;  %v715_v45 = vadd.f32 %v2346_v57, %v523_v53 }
 0x133   : > { %v2471_v39 = vpop.permute.xlu1 %792  ;;  %v797_v9 = vpop.permute.xlu0 %796 }
 0x134   : > { %v876_v12 = vmul.f32 %v2396_v48, %v797_v9  ;;  %1725 = vset.pattern.permute.xlu1 %v2896_v44 }
 0x135   : > { %1216 = vperm.xlu1 %1725, %v2043_v26   ;;  %928 = vperm.xlu0 %1723, %v1911_v4  }
 0x136   : > { %v2482_v51 = vadd.f32 %v876_v12, %v712_v27 }
 0x137   : > { %v801_v40 = vpop.permute.xlu1 %800  ;;  %v805_v34 = vpop.permute.xlu0 %804 }
 0x138   : > { %v877_v9 = vmul.f32 %v2396_v48, %v801_v40  ;;  %v878_v26 = vmul.f32 %v2396_v48, %v805_v34  ;;  %v527_v40 = vmul.f32 %v2370_v30, %v2253_v60 }
 0x139   : > { %1152 = vperm.xlu1 %1725, %v1947_v10   ;;  %988 = vperm.xlu0 %1723, %v1995_v18  }
 0x13a   : > { %v2492_v54 = vadd.f32 %v877_v9, %v713_v25  ;;  %v2494_v27 = vadd.f32 %v878_v26, %v714_v59  ;;  %v2914_v59 = vmov 0   ;;  %v1053_v25 = vsub.s32 2, %v2348_v13 }
 0x13b   : > { %v809_v12 = vpop.permute.xlu1 %808  ;;  %v853_v62 = vpop.permute.xlu0 %852  ;;  %v525_v26 = vmul.f32 %v2370_v30, %v2247_v58  ;;  %v534_v58 = vmul.f32 %v2370_v30, %v2270_v52 }
 0x13c   : > { %v879_v61 = vmul.f32 %v2396_v48, %v809_v12 }
 0x13d   : > { %1726 = vset.pattern.permute.xlu1 %v2900_v31  ;;  %924 = vperm.xlu0 %1723, %v1897_v1   ;;  %v717_v12 = vadd.f32 %v2358_v2, %v525_v26 }
 0x13e   : > { %v2500_v10 = vadd.f32 %v879_v61, %v715_v45  ;;  %812 = vperm.xlu1 %1726, %v2014_v21   ;;  %v518_v45 = vmul.f32 %v2370_v30, %v2221_v49  ;;  %v874_v61 = vmul.f32 %v2396_v48, %v789_v8  ;;  %v2915_v49 = vld [vmem:[#allocation6_spill] sm:$0xff] }
 0x13f   : > { %v849_v55 = vpop.permute.xlu1 %848  ;;  %v2503_v56 = vpop.permute.xlu0 %840 }
 0x141   : > { %1728 = vset.pattern.permute.xlu0 %v2896_v44 }
 0x142   : > { %1727 = vset.pattern.permute.xlu1 %v2896_v44  ;;  %1184 = vperm.xlu0 %1728, %v1995_v18   ;;  %v719_v18 = vadd.f32 %v2367_v47, %v527_v40  ;;  %v710_v40 = vadd.f32 %v2322_v16, %v518_v45 }
 0x143   : > { %1212 = vperm.xlu1 %1727, %v2026_v23   ;;  %v833_v57 = vpop.permute.xlu0 %832 }
 0x144   : > { %v885_v31 = vmul.f32 %v2396_v48, %v833_v57  ;;  %v985_v35 = vpop.permute.xlu1 %984  ;;  %v890_v57 = vmul.f32 %v2396_v48, %v853_v62  ;;  %v906_v52 = vadd.f32 %v874_v61, %v710_v40 }
 0x146   : > { %v2513_v34 = vadd.f32 %v885_v31, %v2379_v42  ;;  %1730 = vset.pattern.permute.xlu0 %v2914_v59  ;;  %v2527_v42 = vrot.slane %v2361_v32, %v1053_v25 }
 0x147   : > { %1148 = vperm.xlu1 %1727, %v1930_v7   ;;  %v825_v44 = vpop.permute.xlu0 %824  ;;  %v1249_v7 = vsub.s32 3, %v2348_v13  ;;  %v726_v13 = vadd.f32 %v2390_v33, %v534_v58 }
 0x148   : > { %v883_v23 = vmul.f32 %v2396_v48, %v825_v44  ;;  %v1070_v2 = vmul.f32 %v2527_v42, %v985_v35 }
 0x149   : > { %v2520_v9 = vpop.permute.xlu1 %844  ;;  %v2545_v25 = vrot.slane %v2361_v32, %v1249_v7  ;;  %v2916_v7 = vld [vmem:[#allocation24_spill] sm:$0xff] }
 0x14a   : > { %v2524_v60 = vadd.f32 %v883_v23, %v719_v18  ;;  %v922_v18 = vadd.f32 %v890_v57, %v726_v13  ;;  %v1102_v23 = vadd.f32 %v1070_v2, %v906_v52 }
 0x14b   : > { %1208 = vperm.xlu1 %1727, %v2031_v24   ;;  %v817_v53 = vpop.permute.xlu0 %816 }
 0x14c   : > { %v881_v47 = vmul.f32 %v2396_v48, %v817_v53 }
 0x14e   : > { %v2539_v31 = vadd.f32 %v881_v47, %v717_v12  ;;  %v1245_v24 = vpop.permute.xlu1 %1244  ;;  %v533_v12 = vmul.f32 %v2370_v30, %v2916_v7  ;;  %v889_v47 = vmul.f32 %v2396_v48, %v849_v55  ;;  %v873_v55 = vmul.f32 %v2396_v48, %v2465_v28  ;;  %v2920_v7 = vld [vmem:[#allocation22_spill] sm:$0xff] }
 0x14f   : > { %1144 = vperm.xlu1 %1727, %v2915_v49   ;;  %v1282_v26 = vmul.f32 %v2545_v25, %v1245_v24  ;;  %v2917_v24 = vld [vmem:[#allocation42_spill] sm:$0xff] }
 0x150   : > { %v1049_v44 = vpop.permute.xlu0 %1048  ;;  %v725_v40 = vadd.f32 %v2917_v24, %v533_v12  ;;  %v532_v12 = vmul.f32 %v2370_v30, %v2920_v7 }
 0x151   : > { %v1086_v8 = vmul.f32 %v2527_v42, %v1049_v44  ;;  %v2919_v44 = vld [vmem:[#allocation34_spill] sm:$0xff] }
 0x152   : > { %v1181_v62 = vpop.permute.xlu1 %1180  ;;  %v921_v49 = vadd.f32 %v889_v47, %v725_v40  ;;  %v888_v47 = vmul.f32 %v2396_v48, %v2520_v9 }
 0x153   : > { %v1118_v53 = vadd.f32 %v1086_v8, %v922_v18  ;;  %v1266_v16 = vmul.f32 %v2545_v25, %v1181_v62  ;;  %1204 = vperm.xlu1 %1727, %v2014_v21   ;;  %v2918_v21 = vld [vmem:[#allocation16_spill] sm:$0xff] }
 0x154   : > { %v1045_v33 = vpop.permute.xlu0 %1044  ;;  %v517_v2 = vmul.f32 %v2370_v30, %v2918_v21 }
 0x155   : > { %v1314_v35 = vadd.f32 %v1282_v26, %v1118_v53  ;;  %v1298_v32 = vadd.f32 %v1266_v16, %v1102_v23  ;;  %v1085_v13 = vmul.f32 %v2527_v42, %v1045_v33 }
 0x156   : > { %v709_v52 = vadd.f32 %v2919_v44, %v517_v2 }
 0x157   : > { %1140 = vperm.xlu1 %1727, %v1918_v5   ;;  %v1041_v45 = vpop.permute.xlu1 %1040  ;;  %v1346_v58 = vmax.f32 %v1314_v35, 0.0  ;;  %v1330_v61 = vmax.f32 %v1298_v32, 0.0  ;;  %v1117_v18 = vadd.f32 %v1085_v13, %v921_v49  ;;  %v872_v13 = vmul.f32 %v2396_v48, %v2461_v15 }
 0x158   : > { %v981_v57 = vpop.permute.xlu0 %980  ;;  %v905_v26 = vadd.f32 %v873_v55, %v709_v52  ;;  %v1084_v24 = vmul.f32 %v2527_v42, %v1041_v45  ;;  %v2923_v55 = vld [vmem:[#allocation32_spill] sm:$0xff] }
 0x159   : > { %1585 = vmatprep.subr.mxu0 %v1346_v58  ;;  %1629 = vmatprep.subr.mxu1 %v1346_v58  ;;  %v1069_v8 = vmul.f32 %v2527_v42, %v981_v57 }
 0x15a   : > { %1586 = vmatpush3.msra.mxu0 %v1330_v61  ;;  %1645 = vmatpush3.msra.mxu1 %v1330_v61 }
 0x15b   : > { %1200 = vperm.xlu1 %1727, %v2019_v22   ;;  %v1101_v33 = vadd.f32 %v1069_v8, %v905_v26 }
 0x15c   : > { %v1241_v5 = vpop.permute.xlu1 %1240  ;;  %v977_v23 = vpop.permute.xlu0 %976 }
 0x15d   : > { %v1281_v62 = vmul.f32 %v2545_v25, %v1241_v5  ;;  %v1068_v44 = vmul.f32 %v2527_v42, %v977_v23 }
 0x15f   : > { %v1313_v53 = vadd.f32 %v1281_v62, %v1117_v18  ;;  %1136 = vperm.xlu1 %1727, %v1923_v6   ;;  %v2921_v6 = vld [vmem:[#allocation40_spill] sm:$0xff] }
 0x160   : > { %v1177_v16 = vpop.permute.xlu1 %1176  ;;  %v1037_v22 = vpop.permute.xlu0 %1036  ;;  %v724_v57 = vadd.f32 %v2921_v6, %v532_v12 }
 0x161   : > { %v1345_v35 = vmax.f32 %v1313_v53, 0.0  ;;  %v1265_v28 = vmul.f32 %v2545_v25, %v1177_v16  ;;  %v2924_v16 = vld [vmem:[#allocation23_spill] sm:$0xff]  ;;  %v1083_v7 = vmul.f32 %v2527_v42, %v1037_v22 }
 0x162   : > { %v920_v21 = vadd.f32 %v888_v47, %v724_v57  ;;  %v531_v23 = vmul.f32 %v2370_v30, %v2924_v16 }
 0x163   : > { %v1297_v32 = vadd.f32 %v1265_v28, %v1101_v33  ;;  %1196 = vperm.xlu1 %1727, %v2002_v19   ;;  %1587 = vmatprep.subr.mxu0 %v1345_v35  ;;  %v2922_v19 = vld [vmem:[#allocation14_spill] sm:$0xff]  ;;  %v887_v33 = vmul.f32 %v2396_v48, %v2503_v56  ;;  %v2925_v28 = vld [vmem:[#allocation41_spill] sm:$0xff] }
 0x164   : > { %1630 = vmatprep.subr.mxu1 %v1345_v35  ;;  %v516_v40 = vmul.f32 %v2370_v30, %v2922_v19  ;;  %v973_v2 = vpop.permute.xlu0 %972  ;;  %v1116_v5 = vadd.f32 %v1084_v24, %v920_v21 }
 0x165   : > { %v1329_v58 = vmax.f32 %v1297_v32, 0.0  ;;  %v2573_v61 = vpop.permute.xlu1 %836  ;;  %v723_v32 = vadd.f32 %v2925_v28, %v531_v23  ;;  %v1067_v19 = vmul.f32 %v2527_v42, %v973_v2  ;;  %v1352_v2 = vld [vmem:[%s2856_s3 + $0x28] sm:$0xff]  ;;  %v870_v23 = vmul.f32 %v2396_v48, %v2455_v46 }
 0x166   : > { %v708_v49 = vadd.f32 %v2923_v55, %v516_v40  ;;  %1453 = vmatprep.mubr.f32.mxu1 %v1352_v2  ;;  %v2932_v2 = vld [vmem:[#allocation13_spill] sm:$0xff] }
 0x167   : > { %1132 = vperm.xlu1 %1727, %v1906_v3   ;;  %1588 = vmatpush3.msra.mxu0 %v1329_v58  ;;  %v919_v6 = vadd.f32 %v887_v33, %v723_v32  ;;  %v2931_v32 = vld [vmem:[#allocation30_spill] sm:$0xff] }
 0x168   : > { %1646 = vmatpush3.msra.mxu1 %v1329_v58  ;;  %v904_v3 = vadd.f32 %v872_v13, %v708_v49  ;;  %v969_v62 = vpop.permute.xlu0 %968  ;;  %v871_v58 = vmul.f32 %v2396_v48, %v2459_v38 }
 0x169   : > { %v1115_v24 = vadd.f32 %v1083_v7, %v919_v6 }
 0x16a   : > { %v1237_v9 = vpop.permute.xlu1 %1236  ;;  %v1100_v8 = vadd.f32 %v1068_v44, %v904_v3 }
 0x16b   : > { %v1280_v45 = vmul.f32 %v2545_v25, %v1237_v9  ;;  %1192 = vperm.xlu1 %1727, %v2007_v20  }
 0x16c   : > { %v2595_v12 = vpop.permute.xlu0 %1028 }
 0x16d   : > { %v1312_v52 = vadd.f32 %v1280_v45, %v1116_v5  ;;  %v886_v45 = vmul.f32 %v2396_v48, %v2573_v61  ;;  %v2930_v61 = vld [vmem:[#allocation12_spill] sm:$0xff] }
 0x16e   : > { %v1173_v18 = vpop.permute.xlu1 %1172  ;;  %v514_v16 = vmul.f32 %v2370_v30, %v2930_v61 }
 0x16f   : > { %v1344_v26 = vmax.f32 %v1312_v52, 0.0  ;;  %v1264_v15 = vmul.f32 %v2545_v25, %v1173_v18  ;;  %1128 = vperm.xlu1 %1727, %v1892_v0   ;;  %v2926_v0 = vld [vmem:[#allocation15_spill] sm:$0xff] }
 0x170   : > { %v515_v47 = vmul.f32 %v2370_v30, %v2926_v0  ;;  %v2605_v13 = vpop.permute.xlu0 %964  ;;  %v706_v7 = vadd.f32 %v2931_v32, %v514_v16  ;;  %v1066_v0 = vmul.f32 %v2527_v42, %v969_v62 }
 0x171   : > { %v1296_v53 = vadd.f32 %v1264_v15, %v1100_v8  ;;  %1589 = vmatprep.subr.mxu0 %v1344_v26  ;;  %1631 = vmatprep.subr.mxu1 %v1344_v26  ;;  %v1355_v8 = vld [vmem:[%s2857_s4] sm:$0xff]  ;;  %v2929_v26 = vld [vmem:[#allocation39_spill] sm:$0xff] }
 0x172   : > { %v902_v46 = vadd.f32 %v870_v23, %v706_v7  ;;  %v2935_v7 = vld [vmem:[#allocation38_spill] sm:$0xff] }
 0x173   : > { %v1328_v20 = vmax.f32 %v1296_v53, 0.0  ;;  %1188 = vperm.xlu1 %1727, %v1990_v17   ;;  %v1033_v35 = vpop.permute.xlu1 %1032  ;;  %v2927_v17 = vld [vmem:[#allocation33_spill] sm:$0xff] }
 0x174   : > { %v707_v57 = vadd.f32 %v2927_v17, %v515_v47  ;;  %v2620_v3 = vpop.permute.xlu0 %960  ;;  %v1082_v53 = vmul.f32 %v2527_v42, %v1033_v35  ;;  %v1468_v35 = vld [vmem:[%s2858_s5] sm:$0xff]  ;;  %v1358_v17 = vld [vmem:[%s2857_s4 + $0x18] sm:$0xff] }
 0x175   : > { %1590 = vmatpush3.msra.mxu0 %v1328_v20  ;;  %1647 = vmatpush3.msra.mxu1 %v1328_v20  ;;  %v1357_v20 = vld [vmem:[%s2857_s4 + $0x10] sm:$0xff] }
 0x176   : > { %v903_v40 = vadd.f32 %v871_v58, %v707_v57  ;;  %v1470_v57 = vld [vmem:[%s2858_s5 + $0x10] sm:$0xff] }
 0x177   : > { %1124 = vperm.xlu1 %1727, %v1911_v4   ;;  %v1348_v4 = vld [vmem:[%s2856_s3 + $0x8] sm:$0xff] }
 0x178   : > { %v1233_v56 = vpop.permute.xlu1 %1232  ;;  %v1099_v55 = vadd.f32 %v1067_v19, %v903_v40  ;;  %1443 = vmatprep.mubr.f32.mxu0 %v1348_v4  ;;  %v2644_v58 = vpop.permute.xlu0 %1020  ;;  %v1098_v19 = vadd.f32 %v1066_v0, %v902_v46  ;;  %v1471_v4 = vld [vmem:[%s2858_s5 + $0x18] sm:$0xff] }
 0x179   : > { %v1279_v22 = vmul.f32 %v2545_v25, %v1233_v56 }
 0x17b   : > { %v1311_v21 = vadd.f32 %v1279_v22, %v1115_v24  ;;  %1120 = vperm.xlu1 %1727, %v1897_v1   ;;  %v2928_v1 = vld [vmem:[#allocation21_spill] sm:$0xff] }
 0x17c   : > { %v1169_v9 = vpop.permute.xlu1 %1168  ;;  %v530_v44 = vmul.f32 %v2370_v30, %v2928_v1  ;;  %v2654_v40 = vpop.permute.xlu0 %956  ;;  %v869_v1 = vmul.f32 %v2396_v48, %v2453_v43 }
 0x17d   : > { %v1343_v38 = vmax.f32 %v1311_v21, 0.0  ;;  %v1263_v49 = vmul.f32 %v2545_v25, %v1169_v9  ;;  %v1469_v9 = vld [vmem:[%s2858_s5 + $0x8] sm:$0xff] }
 0x17e   : > { %v722_v15 = vadd.f32 %v2929_v26, %v530_v44  ;;  %v1065_v26 = vmul.f32 %v2527_v42, %v2605_v13 }
 0x17f   : > { %v1295_v5 = vadd.f32 %v1263_v49, %v1099_v55  ;;  %1591 = vmatprep.subr.mxu0 %v1343_v38  ;;  %1632 = vmatprep.subr.mxu1 %v1343_v38  ;;  %v1081_v49 = vmul.f32 %v2527_v42, %v2595_v12 }
 0x180   : > { %1729 = vset.pattern.permute.xlu1 %v2914_v59  ;;  %v1356_v59 = vld [vmem:[%s2857_s4 + $0x8] sm:$0xff]  ;;  %v918_v33 = vadd.f32 %v886_v45, %v722_v15  ;;  %v2668_v44 = vpop.permute.xlu0 %952 }
 0x181   : > { %v1327_v52 = vmax.f32 %v1295_v5, 0.0  ;;  %v2622_v18 = vpop.permute.xlu1 %828  ;;  %1361 = vperm.xlu1 %1729, %v1355_v8   ;;  %1366 = vperm.xlu0 %1730, %v1356_v59   ;;  %v513_v5 = vmul.f32 %v2370_v30, %v2932_v2  ;;  %v1113_v12 = vadd.f32 %v1081_v49, %v2513_v34  ;;  %v2936_v2 = vld [vmem:[#allocation11_spill] sm:$0xff] }
 0x182   : > { %v1114_v47 = vadd.f32 %v1082_v53, %v918_v33  ;;  %v884_v13 = vmul.f32 %v2396_v48, %v2622_v18 }
 0x183   : > { %1592 = vmatpush3.msra.mxu0 %v1327_v52  ;;  %1648 = vmatpush3.msra.mxu1 %v1327_v52  ;;  %v2933_v52 = vld [vmem:[#allocation31_spill] sm:$0xff] }
 0x184   : > { %v705_v8 = vadd.f32 %v2933_v52, %v513_v5  ;;  %v2675_v23 = vpop.permute.xlu0 %1012  ;;  %v511_v5 = vmul.f32 %v2370_v30, %v2936_v2  ;;  %v2942_v2 = vld [vmem:[#allocation28_spill] sm:$0xff] }
 0x185   : > { %1371 = vperm.xlu1 %1729, %v1357_v20   ;;  %1474 = vperm.xlu0 %1730, %v1468_v35   ;;  %v2934_v35 = vld [vmem:[#allocation20_spill] sm:$0xff] }
 0x186   : > { %v1229_v28 = vpop.permute.xlu1 %1228  ;;  %v901_v53 = vadd.f32 %v869_v1, %v705_v8  ;;  %v528_v34 = vmul.f32 %v2370_v30, %v2934_v35 }
 0x187   : > { %v1278_v6 = vmul.f32 %v2545_v25, %v1229_v28 }
 0x188   : > { %v1097_v16 = vadd.f32 %v1065_v26, %v901_v53  ;;  %v720_v0 = vadd.f32 %v2935_v7, %v528_v34 }
 0x189   : > { %v1310_v56 = vadd.f32 %v1278_v6, %v1114_v47  ;;  %1376 = vperm.xlu1 %1729, %v1358_v17   ;;  %1484 = vperm.xlu0 %1730, %v1470_v57   ;;  %v2683_v47 = vpop.permute.xlu0 %948  ;;  %v1064_v17 = vmul.f32 %v2527_v42, %v2620_v3  ;;  %v1079_v3 = vmul.f32 %v2527_v42, %v2644_v58 }
 0x18a   : > { %v1165_v24 = vpop.permute.xlu1 %1164  ;;  %v916_v46 = vadd.f32 %v884_v13, %v720_v0  ;;  %v2939_v13 = vld [vmem:[#allocation37_spill] sm:$0xff] }
 0x18b   : > { %v1342_v62 = vmax.f32 %v1310_v56, 0.0  ;;  %v1262_v22 = vmul.f32 %v2545_v25, %v1165_v24  ;;  %v1111_v8 = vadd.f32 %v1079_v3, %v2524_v60  ;;  %v2938_v60 = vld [vmem:[#allocation19_spill] sm:$0xff]  ;;  %v2941_v3 = vld [vmem:[#allocation18_spill] sm:$0xff] }
 0x18d   : > { %v1294_v21 = vadd.f32 %v1262_v22, %v1098_v19  ;;  %1593 = vmatprep.subr.mxu0 %v1342_v62  ;;  %1633 = vmatprep.subr.mxu1 %v1342_v62  ;;  %v2689_v19 = vpop.permute.xlu0 %1008  ;;  %v1096_v22 = vadd.f32 %v1064_v17, %v2449_v37  ;;  %v867_v37 = vmul.f32 %v2396_v48, %v2444_v41 }
 0x18e   : > { %1479 = vperm.xlu1 %1729, %v1469_v9  }
 0x18f   : > { %v1326_v55 = vmax.f32 %v1294_v21, 0.0  ;;  %v1025_v38 = vpop.permute.xlu1 %1024 }
 0x190   : > { %v1080_v6 = vmul.f32 %v2527_v42, %v1025_v38 }
 0x191   : > { %1594 = vmatpush3.msra.mxu0 %v1326_v55  ;;  %1649 = vmatpush3.msra.mxu1 %v1326_v55  ;;  %v2693_v38 = vpop.permute.xlu0 %944 }
 0x192   : > { %1489 = vperm.xlu1 %1729, %v1471_v4   ;;  %v1112_v57 = vadd.f32 %v1080_v6, %v916_v46 }
 0x194   : > { %v1225_v45 = vpop.permute.xlu1 %1224 }
 0x195   : > { %v1277_v15 = vmul.f32 %v2545_v25, %v1225_v45  ;;  %v2937_v45 = vld [vmem:[#allocation29_spill] sm:$0xff]  ;;  %v2705_v26 = vpop.permute.xlu0 %1004 }
 0x196   : > { %v703_v52 = vadd.f32 %v2937_v45, %v511_v5 }
 0x197   : > { %v1309_v59 = vadd.f32 %v1277_v15, %v1113_v12  ;;  %v1063_v12 = vmul.f32 %v2527_v42, %v2654_v40 }
 0x198   : > { %v1161_v61 = vpop.permute.xlu1 %1160  ;;  %v899_v15 = vadd.f32 %v867_v37, %v703_v52 }
 0x199   : > { %v1341_v43 = vmax.f32 %v1309_v59, 0.0  ;;  %v1261_v33 = vmul.f32 %v2545_v25, %v1161_v61  ;;  %v2709_v41 = vpop.permute.xlu0 %940 }
 0x19a   : > { %v1095_v61 = vadd.f32 %v1063_v12, %v899_v15 }
 0x19b   : > { %v1293_v20 = vadd.f32 %v1261_v33, %v1097_v16  ;;  %1595 = vmatprep.subr.mxu0 %v1341_v43  ;;  %1634 = vmatprep.subr.mxu1 %v1341_v43 }
 0x19d   : > { %v1325_v28 = vmax.f32 %v1293_v20, 0.0  ;;  %v821_v32 = vpop.permute.xlu1 %820  ;;  %v526_v20 = vmul.f32 %v2370_v30, %v2938_v60  ;;  %v2716_v0 = vpop.permute.xlu0 %1000 }
 0x19e   : > { %v882_v40 = vmul.f32 %v2396_v48, %v821_v32  ;;  %v1077_v32 = vmul.f32 %v2527_v42, %v2675_v23  ;;  %v524_v23 = vmul.f32 %v2370_v30, %v2941_v3  ;;  %v1074_v3 = vmul.f32 %v2527_v42, %v2716_v0 }
 0x19f   : > { %1596 = vmatpush3.msra.mxu0 %v1325_v28  ;;  %1650 = vmatpush3.msra.mxu1 %v1325_v28  ;;  %v718_v28 = vadd.f32 %v2939_v13, %v526_v20  ;;  %v1060_v20 = vmul.f32 %v2527_v42, %v2693_v38 }
 0x1a1   : > { %v914_v6 = vadd.f32 %v882_v40, %v718_v28 }
 0x1a2   : > { %v1221_v56 = vpop.permute.xlu1 %1220 }
 0x1a3   : > { %v1276_v24 = vmul.f32 %v2545_v25, %v1221_v56  ;;  %v1062_v56 = vmul.f32 %v2527_v42, %v2668_v44  ;;  %v865_v44 = vmul.f32 %v2396_v48, %v2433_v11  ;;  %v2943_v11 = vld [vmem:[#allocation36_spill] sm:$0xff] }
 0x1a4   : > { %v716_v12 = vadd.f32 %v2943_v11, %v524_v23 }
 0x1a5   : > { %v1308_v18 = vadd.f32 %v1276_v24, %v1112_v57 }
 0x1a6   : > { %v1157_v62 = vpop.permute.xlu1 %1156 }
 0x1a7   : > { %v1340_v21 = vmax.f32 %v1308_v18, 0.0  ;;  %v1260_v9 = vmul.f32 %v2545_v25, %v1157_v62  ;;  %v1094_v62 = vadd.f32 %v1062_v56, %v2441_v63  ;;  %v1109_v63 = vadd.f32 %v1077_v32, %v2539_v31 }
 0x1a9   : > { %v1292_v55 = vadd.f32 %v1260_v9, %v1096_v22  ;;  %1597 = vmatprep.subr.mxu0 %v1340_v21  ;;  %1635 = vmatprep.subr.mxu1 %v1340_v21  ;;  %v2724_v22 = vpop.permute.xlu0 %936 }
 0x1ab   : > { %v1324_v49 = vmax.f32 %v1292_v55, 0.0  ;;  %v1017_v4 = vpop.permute.xlu1 %1016  ;;  %v2940_v55 = vld [vmem:[#allocation10_spill] sm:$0xff] }
 0x1ac   : > { %v1078_v7 = vmul.f32 %v2527_v42, %v1017_v4 }
 0x1ad   : > { %1598 = vmatpush3.msra.mxu0 %v1324_v49  ;;  %1651 = vmatpush3.msra.mxu1 %v1324_v49  ;;  %v509_v49 = vmul.f32 %v2370_v30, %v2940_v55  ;;  %v2740_v15 = vpop.permute.xlu0 %996 }
 0x1ae   : > { %v1110_v17 = vadd.f32 %v1078_v7, %v914_v6  ;;  %v1092_v6 = vadd.f32 %v1060_v20, %v2431_v14 }
 0x1af   : > { %v701_v5 = vadd.f32 %v2942_v2, %v509_v49 }
 0x1b0   : > { %v1217_v1 = vpop.permute.xlu1 %1216 }
 0x1b1   : > { %v1275_v58 = vmul.f32 %v2545_v25, %v1217_v1  ;;  %v1061_v1 = vmul.f32 %v2527_v42, %v2683_v47  ;;  %v1076_v47 = vmul.f32 %v2527_v42, %v2689_v19  ;;  %v933_v40 = vpop.permute.xlu0 %932  ;;  %v1075_v19 = vmul.f32 %v2527_v42, %v2705_v26 }
 0x1b2   : > { %v1059_v26 = vmul.f32 %v2527_v42, %v2709_v41 }
 0x1b3   : > { %v1307_v53 = vadd.f32 %v1275_v58, %v1111_v8  ;;  %v897_v58 = vadd.f32 %v865_v44, %v701_v5  ;;  %v1107_v14 = vadd.f32 %v1075_v19, %v2500_v10  ;;  %v2949_v19 = vld [vmem:[#allocation17_spill] sm:$0xff] }
 0x1b4   : > { %v1153_v59 = vpop.permute.xlu1 %1152 }
 0x1b5   : > { %v1339_v16 = vmax.f32 %v1307_v53, 0.0  ;;  %v1259_v43 = vmul.f32 %v2545_v25, %v1153_v59 }
 0x1b7   : > { %v1291_v33 = vadd.f32 %v1259_v43, %v1095_v61  ;;  %1599 = vmatprep.subr.mxu0 %v1339_v16  ;;  %1636 = vmatprep.subr.mxu1 %v1339_v16  ;;  %v1093_v61 = vadd.f32 %v1061_v1, %v897_v58 }
 0x1b9   : > { %v1323_v35 = vmax.f32 %v1291_v33, 0.0  ;;  %v813_v34 = vpop.permute.xlu1 %812 }
 0x1ba   : > { %v880_v45 = vmul.f32 %v2396_v48, %v813_v34 }
 0x1bb   : > { %1600 = vmatpush3.msra.mxu0 %v1323_v35  ;;  %1652 = vmatpush3.msra.mxu1 %v1323_v35 }
 0x1bc   : > { %v912_v31 = vadd.f32 %v880_v45, %v716_v12  ;;  %v1073_v12 = vmul.f32 %v2527_v42, %v2740_v15 }
 0x1be   : > { %v1213_v46 = vpop.permute.xlu1 %1212  ;;  %v1108_v34 = vadd.f32 %v1076_v47, %v912_v31  ;;  %v2947_v31 = vld [vmem:[#allocation26_spill] sm:$0xff]  ;;  %v1057_v47 = vmul.f32 %v2527_v42, %v933_v40  ;;  %v519_v40 = vmul.f32 %v2370_v30, %v2949_v19 }
 0x1bf   : > { %v1274_v57 = vmul.f32 %v2545_v25, %v1213_v46 }
 0x1c1   : > { %v1306_v24 = vadd.f32 %v1274_v57, %v1110_v17  ;;  %v2944_v17 = vld [vmem:[#allocation9_spill] sm:$0xff]  ;;  %v863_v57 = vmul.f32 %v2396_v48, %v2423_v36 }
 0x1c2   : > { %v1149_v18 = vpop.permute.xlu1 %1148  ;;  %v507_v38 = vmul.f32 %v2370_v30, %v2944_v17 }
 0x1c3   : > { %v1338_v21 = vmax.f32 %v1306_v24, 0.0  ;;  %v1258_v9 = vmul.f32 %v2545_v25, %v1149_v18  ;;  %v993_v24 = vpop.permute.xlu0 %992  ;;  %v2945_v18 = vld [vmem:[#allocation27_spill] sm:$0xff] }
 0x1c5   : > { %v1290_v4 = vadd.f32 %v1258_v9, %v1094_v62  ;;  %1601 = vmatprep.subr.mxu0 %v1338_v21  ;;  %1637 = vmatprep.subr.mxu1 %v1338_v21  ;;  %v699_v62 = vadd.f32 %v2945_v18, %v507_v38  ;;  %v2952_v18 = vld [vmem:[#allocation35_spill] sm:$0xff] }
 0x1c6   : > { %v1209_v37 = vpop.permute.xlu1 %1208 }
 0x1c7   : > { %v1322_v52 = vmax.f32 %v1290_v4, 0.0  ;;  %v1273_v8 = vmul.f32 %v2545_v25, %v1209_v37  ;;  %v895_v49 = vadd.f32 %v863_v57, %v699_v62  ;;  %v929_v23 = vpop.permute.xlu0 %928  ;;  %v1058_v37 = vmul.f32 %v2527_v42, %v2724_v22 }
 0x1c8   : > { %v861_v22 = vmul.f32 %v2396_v48, %v2412_v50  ;;  %v711_v62 = vadd.f32 %v2952_v18, %v519_v40 }
 0x1c9   : > { %v1305_v53 = vadd.f32 %v1273_v8, %v1109_v63  ;;  %1602 = vmatpush3.msra.mxu0 %v1322_v52  ;;  %1653 = vmatpush3.msra.mxu1 %v1322_v52  ;;  %v1091_v4 = vadd.f32 %v1059_v26, %v895_v49  ;;  %v1106_v63 = vadd.f32 %v1074_v3, %v2494_v27  ;;  %v2946_v27 = vld [vmem:[#allocation7_spill] sm:$0xff] }
 0x1ca   : > { %v1145_v59 = vpop.permute.xlu1 %1144  ;;  %v1090_v11 = vadd.f32 %v1058_v37, %v2421_v29  ;;  %v1105_v29 = vadd.f32 %v1073_v12, %v2492_v54  ;;  %v1350_v12 = vld [vmem:[%s2856_s3 + $0x18] sm:$0xff] }
 0x1cb   : > { %v1337_v16 = vmax.f32 %v1305_v53, 0.0  ;;  %v1257_v43 = vmul.f32 %v2545_v25, %v1145_v59  ;;  %v989_v52 = vpop.permute.xlu0 %988  ;;  %v505_v59 = vmul.f32 %v2370_v30, %v2946_v27 }
 0x1cd   : > { %v1289_v33 = vadd.f32 %v1257_v43, %v1093_v61  ;;  %1603 = vmatprep.subr.mxu0 %v1337_v16  ;;  %1638 = vmatprep.subr.mxu1 %v1337_v16  ;;  %v697_v16 = vadd.f32 %v2947_v31, %v505_v59 }
 0x1ce   : > { %v1205_v60 = vpop.permute.xlu1 %1204 }
 0x1cf   : > { %v1321_v35 = vmax.f32 %v1289_v33, 0.0  ;;  %v1272_v13 = vmul.f32 %v2545_v25, %v1205_v60  ;;  %v925_v15 = vpop.permute.xlu0 %924  ;;  %v893_v20 = vadd.f32 %v861_v22, %v697_v16 }
 0x1d1   : > { %v1304_v28 = vadd.f32 %v1272_v13, %v1108_v34  ;;  %1604 = vmatpush3.msra.mxu0 %v1321_v35  ;;  %1654 = vmatpush3.msra.mxu1 %v1321_v35  ;;  %v1089_v50 = vadd.f32 %v1057_v47, %v893_v20  ;;  %v1072_v13 = vmul.f32 %v2527_v42, %v993_v24  ;;  %v2951_v24 = vld [vmem:[#allocation25_spill] sm:$0xff] }
 0x1d2   : > { %v1141_v7 = vpop.permute.xlu1 %1140 }
 0x1d3   : > { %v1336_v46 = vmax.f32 %v1304_v28, 0.0  ;;  %v1256_v56 = vmul.f32 %v2545_v25, %v1141_v7  ;;  %v1185_v38 = vpop.permute.xlu0 %1184  ;;  %v1104_v26 = vadd.f32 %v1072_v13, %v2482_v51 }
 0x1d5   : > { %v1288_v32 = vadd.f32 %v1256_v56, %v1092_v6  ;;  %1605 = vmatprep.subr.mxu0 %v1336_v46  ;;  %1639 = vmatprep.subr.mxu1 %v1336_v46  ;;  %v2948_v6 = vld [vmem:[#allocation8_spill] sm:$0xff]  ;;  %v875_v46 = vmul.f32 %v2396_v48, %v2471_v39  ;;  %v2950_v56 = vld [vmem:[#allocation43_spill] sm:$0xff] }
 0x1d6   : > { %v1201_v21 = vpop.permute.xlu1 %1200  ;;  %v504_v54 = vmul.f32 %v2370_v30, %v2948_v6  ;;  %v860_v17 = vmul.f32 %v2396_v48, %v2950_v56  ;;  %v1056_v30 = vmul.f32 %v2527_v42, %v929_v23  ;;  %v1267_v48 = vmul.f32 %v2545_v25, %v1185_v38 }
 0x1d7   : > { %v1320_v9 = vmax.f32 %v1288_v32, 0.0  ;;  %v1271_v55 = vmul.f32 %v2545_v25, %v1201_v21  ;;  %v1071_v21 = vmul.f32 %v2527_v42, %v989_v52 }
 0x1d8   : > { %v696_v32 = vadd.f32 %v2951_v24, %v504_v54 }
 0x1d9   : > { %v1303_v44 = vadd.f32 %v1271_v55, %v1107_v14  ;;  %1606 = vmatpush3.msra.mxu0 %v1320_v9  ;;  %1655 = vmatpush3.msra.mxu1 %v1320_v9  ;;  %v907_v55 = vadd.f32 %v875_v46, %v711_v62 }
 0x1da   : > { %v1137_v36 = vpop.permute.xlu1 %1136  ;;  %v892_v49 = vadd.f32 %v860_v17, %v696_v32 }
 0x1db   : > { %v1335_v2 = vmax.f32 %v1303_v44, 0.0  ;;  %v1255_v5 = vmul.f32 %v2545_v25, %v1137_v36  ;;  %v1103_v36 = vadd.f32 %v1071_v21, %v907_v55 }
 0x1dc   : > { %v1088_v3 = vadd.f32 %v1056_v30, %v892_v49  ;;  %v1506_v49 = vstv %s1505_s14 }
 0x1dd   : > { %v1287_v10 = vadd.f32 %v1255_v5, %v1091_v4  ;;  %1607 = vmatprep.subr.mxu0 %v1335_v2  ;;  %1640 = vmatprep.subr.mxu1 %v1335_v2  ;;  %v1055_v2 = vmul.f32 %v2527_v42, %v925_v15 }
 0x1de   : > { %v1197_v41 = vpop.permute.xlu1 %1196 }
 0x1df   : > { %v1319_v1 = vmax.f32 %v1287_v10, 0.0  ;;  %v1270_v45 = vmul.f32 %v2545_v25, %v1197_v41  ;;  %v1299_v10 = vadd.f32 %v1267_v48, %v1103_v36 }
 0x1e1   : > { %v1302_v8 = vadd.f32 %v1270_v45, %v1106_v63  ;;  %1608 = vmatpush3.msra.mxu0 %v1319_v1  ;;  %1656 = vmatpush3.msra.mxu1 %v1319_v1  ;;  %v2953_v63 = vld [vmem:[#allocation44_spill] sm:$0xff]  ;;  %v1331_v52 = vmax.f32 %v1299_v10, 0.0 }
 0x1e2   : > { %v1133_v0 = vpop.permute.xlu1 %1132  ;;  %v1087_v37 = vadd.f32 %v1055_v2, %v2953_v63 }
 0x1e3   : > { %v1334_v58 = vmax.f32 %v1302_v8, 0.0  ;;  %v1254_v53 = vmul.f32 %v2545_v25, %v1133_v0  ;;  %v1347_v0 = vld [vmem:[%s2856_s3] sm:$0xff] }
 0x1e5   : > { %v1286_v61 = vadd.f32 %v1254_v53, %v1090_v11  ;;  %1609 = vmatprep.subr.mxu0 %v1334_v58  ;;  %1641 = vmatprep.subr.mxu1 %v1334_v58  ;;  %v1351_v11 = vld [vmem:[%s2856_s3 + $0x20] sm:$0xff]  ;;  %v1349_v58 = vld [vmem:[%s2856_s3 + $0x10] sm:$0xff] }
 0x1e6   : > { %v1193_v43 = vpop.permute.xlu1 %1192  ;;  %v1353_v53 = vld [vmem:[%s2856_s3 + $0x30] sm:$0xff] }
 0x1e7   : > { %v1318_v33 = vmax.f32 %v1286_v61, 0.0  ;;  %v1269_v60 = vmul.f32 %v2545_v25, %v1193_v43 }
 0x1e9   : > { %v1301_v35 = vadd.f32 %v1269_v60, %v1105_v29  ;;  %1610 = vmatpush3.msra.mxu0 %v1318_v33  ;;  %1657 = vmatpush3.msra.mxu1 %v1318_v33 }
 0x1ea   : > { %v1129_v34 = vpop.permute.xlu1 %1128 }
 0x1eb   : > { %v1333_v28 = vmax.f32 %v1301_v35, 0.0  ;;  %v1253_v7 = vmul.f32 %v2545_v25, %v1129_v34 }
 0x1ed   : > { %v1285_v57 = vadd.f32 %v1253_v7, %v1089_v50  ;;  %1611 = vmatprep.subr.mxu0 %v1333_v28  ;;  %1642 = vmatprep.subr.mxu1 %v1333_v28 }
 0x1ee   : > { %v1189_v14 = vpop.permute.xlu1 %1188 }
 0x1ef   : > { %v1317_v9 = vmax.f32 %v1285_v57, 0.0  ;;  %v1268_v39 = vmul.f32 %v2545_v25, %v1189_v14 }
 0x1f1   : > { %v1300_v44 = vadd.f32 %v1268_v39, %v1104_v26  ;;  %1612 = vmatpush3.msra.mxu0 %v1317_v9  ;;  %1658 = vmatpush3.msra.mxu1 %v1317_v9 }
 0x1f2   : > { %v1125_v4 = vpop.permute.xlu1 %1124 }
 0x1f3   : > { %v1332_v5 = vmax.f32 %v1300_v44, 0.0  ;;  %v1252_v51 = vmul.f32 %v2545_v25, %v1125_v4 }
 0x1f5   : > { %v1284_v23 = vadd.f32 %v1252_v51, %v1088_v3  ;;  %1613 = vmatprep.subr.mxu0 %v1332_v5  ;;  %1643 = vmatprep.subr.mxu1 %v1332_v5 }
 0x1f6   : > { %v1121_v41 = vpop.permute.xlu1 %1120 }
 0x1f7   : > { %v1316_v1 = vmax.f32 %v1284_v23, 0.0  ;;  %v1251_v45 = vmul.f32 %v2545_v25, %v1121_v41  ;;  %v1354_v25 = vld [vmem:[%s2856_s3 + $0x38] sm:$0xff] }
 0x1f9   : > { %v1283_v8 = vadd.f32 %v1251_v45, %v1087_v37  ;;  %1614 = vmatpush3.msra.mxu0 %v1316_v1  ;;  %1659 = vmatpush3.msra.mxu1 %v1316_v1 }
 0x1fa   : > { %1615 = vmatprep.subr.mxu0 %v1331_v52  ;;  %1644 = vmatprep.subr.mxu1 %v1331_v52 }
 0x1fb   : > { %v1315_v42 = vmax.f32 %v1283_v8, 0.0 }
 0x1fc   : > { %v1362_v27 = vpop.permute.xlu1 %1361  ;;  %v1367_v31 = vpop.permute.xlu0 %1366 }
 0x1fd   : > { %1616 = vmatpush3.msra.mxu0 %v1315_v42  ;;  %1660 = vmatpush3.msra.mxu1 %v1315_v42 }
 0x1fe   : > { %1444 = vmatmul.mubr.f32.vlgmr.msra.gmra.mxu0 %v1347_v0  ;;  %1454 = vmatmul.mubr.f32.vlgmr.msra.gmra.mxu1 %v1351_v11 }
 0x1ff   : > { %1448 = vmatprep.mubr.f32.mxu0 %v1350_v12  ;;  %1458 = vmatprep.mubr.f32.mxu1 %v1354_v25 }
 0x200   : > { %v1372_v59 = vpop.permute.xlu1 %1371  ;;  %v1475_v7 = vpop.permute.xlu0 %1474 }
 0x202   : > { %1449 = vmatmul.mubr.f32.gmra.mxu0 %v1349_v58  ;;  %1459 = vmatmul.mubr.f32.gmra.mxu1 %v1353_v53 }
 0x204   : > { %v1377_v29 = vpop.permute.xlu1 %1376  ;;  %v1485_v24 = vpop.permute.xlu0 %1484 }
 0x209   : > { %v1480_v40 = vpop.permute.xlu1 %1479 }
 0x20d   : > { %v1490_v62 = vpop.permute.xlu1 %1489 }
 0x2be   : > { %v1617_v22 = vpop.f32.mrf.mxu0  ;;  %v1623_v61 = vpop.f32.mrf.mxu1 }
 0x2c0   : > { %v1618_v16 = vpop.f32.mrf.mxu0  ;;  %v1624_v43 = vpop.f32.mrf.mxu1 }
 0x2c1   : > { %v1619_v47 = vadd.f32 %v1618_v16, %v1617_v22  ;;  %v1625_v15 = vadd.f32 %v1624_v43, %v1623_v61 }
 0x2c2   : > { %v1620_v33 = vpop.f32.mrf.mxu0  ;;  %v1626_v60 = vpop.f32.mrf.mxu1 }
 0x2c3   : > { %v1446_v20 = vadd.f32 %v1619_v47, %v1362_v27  ;;  %v1456_v50 = vadd.f32 %v1625_v15, %v1372_v59 }
 0x2c4   : > { %v1621_v35 = vpop.f32.mrf.mxu0  ;;  %v1627_v34 = vpop.f32.mrf.mxu1 }
 0x2c5   : > { %v1622_v13 = vadd.f32 %v1621_v35, %v1620_v33  ;;  %v1628_v28 = vadd.f32 %v1627_v34, %v1626_v60  ;;  %v1464_v6 = vmax.f32 %v1446_v20, 0.0  ;;  %v1466_v46 = vmax.f32 %v1456_v50, 0.0 }
 0x2c7   : > { %v1451_v54 = vadd.f32 %v1622_v13, %v1367_v31  ;;  %v1461_v19 = vadd.f32 %v1628_v28, %v1377_v29  ;;  %v1492_v17 = vmul.f32 %v1475_v7, %v1464_v6  ;;  %v1494_v32 = vmul.f32 %v1485_v24, %v1466_v46 }
 0x2c9   : > { %v1465_v56 = vmax.f32 %v1451_v54, 0.0  ;;  %v1467_v57 = vmax.f32 %v1461_v19, 0.0 }
 0x2cb   : > { %v1493_v38 = vmul.f32 %v1480_v40, %v1465_v56  ;;  %v1495_v21 = vmul.f32 %v1490_v62, %v1467_v57 }
 0x2cd   : > { %v1496_v18 = vadd.f32 %v1493_v38, %v1492_v17 }
 0x2cf   : > { %v1497_v14 = vadd.f32 %v1496_v18, %v1494_v32 }
 0x2d1   : > { %v1498_v26 = vadd.f32 %v1497_v14, %v1495_v21 }
 0x2d3   : > { %v1499_v30 = vrot.slane %v1498_v26, 4 }
 0x2d5   : > { %v1500_v9 = vadd.f32 %v1499_v30, %v1498_v26 }
 0x2d7   : > { %v1501_v39 = vrot.slane %v1500_v9, 2 }
 0x2d9   : > { %v1502_v55 = vadd.f32 %v1501_v39, %v1500_v9 }
 0x2db   : > { %v1503_v48 = vrot.slane %v1502_v55, 1 }
 0x2dd   : > { %v1504_v44 = vadd.f32 %v1503_v48, %v1502_v55 }
 0x2df   : > { %v1507_v36 = vadd.f32 %v1506_v49, %v1504_v44 }
 0x2e1   : > { %1508 = vst [vmem:[%s269_s17] sm:$0x1] %v1507_v36 }
 0x2e2   : > { %1744 = shalt.err (!%p1741_p3)
}
 0x2e3   : > { %s1745_s30 = scalar_lea.hbm %s1520_s21, 16  ;;  %s1749_s14 = scalar_lea.hbm %s2860_s7, 32 }
 0x2e4   : > { %p1746_p4 = scmp.ne.s32.totalorder %s1520_s21, %s1745_s30  ;;  %p1750_p9 = scmp.lt.s32.totalorder %s1520_s21, %s2860_s7 }
 0x2e5   : > { %p1751_p10 = scmp.lt.s32.totalorder %s1749_s14, %s1745_s30 }
 0x2e6   : > { %p1747_p7 = pnand %p1746_p4, %p1879_p5 }
 0x2e7   : > { %p1752_p11 = por %p1751_p10, %p1750_p9 }
 0x2e8   : > { %p1748_p8 = pneg %p1747_p7 }
 0x2ea   : > { %p1753_p12 = pnand %p1752_p11, %p1748_p8 }
 0x2ec   : > { %1756 = shalt.err (!%p1753_p12)
}
 0x2ed   : > { %1661 = dma.vmem_to_hbm [thread:$0]  (%p1879_p5), %s1523_s18, 16, %s1520_s21, %s1510_s22  }
 0x2ee PF: > { %p1667_p13 = scmp.ge.s32.totalorder %s1791_s29, 2  ;;  %s1534_s17 = sand.u32 1, %s1779_s26  }
 0x2ef   : > { %s1535_s19 = scalar_lea.sflag [#allocation4], %s1534_s17 }
 0x2f0   : > { %p1664_p0 = pnand %p1667_p13, %p1883_p6 }
 0x2f2   : > { %p1665_p1 = pneg %p1664_p0 }
 0x2f4   : > { %1774 = dma.done.wait (%p1665_p1), %s1535_s19, 16  }
 0x2f5   : > { %1776 = vsyncadd (%p1665_p1), %s1535_s19, 4294967280  ;;  %p18_p2 = scmp.ge.s32.totalorder %s1866_s8, 4   ;;  %s2954_s26 = smov %s1783_s27 }
 0x2f6   : > { %s2955_s27 = smov %s1787_s28  ;;  %s2956_s28 = smov %s1877_s11 }
 0x2f7   : > { %s2957_s29 = smov %s1866_s8  ;;  %20 = sbr.rel (!%p18_p2) target bundleno = 5 (0x5), region = 83 }
 0x2fc   :  { %1539 = vsyncpa [#allocation4], 1 }
 0x2fd   :  { %1541 = vsyncpa [#allocation4 + $0x1], 1 }

</bundles_post_ra>
